<compile_context>
chip_gen: v5e
topology: v5e:2x2
jax: 0.10.0
libtpu: 0.0.40
codegen_flags: <defaults>
</compile_context>

<pallas_src>
import functools
import math

import jax
import jax.numpy as jnp
from jax import lax
from jax.experimental import pallas as pl
from jax.experimental.pallas import tpu as pltpu


# ----------------------------------------------------------------------------
# Single fused kernel: MHA (packed QKV) + fc/residual/LayerNorm + masked FFN
# ----------------------------------------------------------------------------
def _make_fft_kernel(*, H, dk, dv, K, pad, padr, scale, eps, Bb, T, D,
                     mask_mode, emit_attn):
    """mask_mode: 0 = none, 1 = shared (T,T) additive bias, 2 = per-batch (Bb,T,T)."""

    def kernel(*refs):
        i = 0
        x_ref = refs[i]; i += 1
        npm_ref = refs[i]; i += 1
        bias_ref = None
        if mask_mode:
            bias_ref = refs[i]; i += 1
        (wq_ref, bq_ref, wk_ref, bk_ref, wv_ref, bv_ref,
         wfc_ref, bfc_ref, g_ref, beta_ref,
         w1_ref, b1_ref, w2_ref, b2_ref) = refs[i:i + 14]
        i += 14
        out_ref = refs[i]; i += 1
        attn_ref = None
        if emit_attn:
            attn_ref = refs[i]; i += 1
        xpad_scr = refs[i]; i += 1

        f32 = jnp.float32
        bf16 = jnp.bfloat16

        # Zero only the conv halo rows; the [padr, padr+T) body rows are fully
        # overwritten for every batch element below.  (Done every grid step so
        # correctness never depends on scratch persistence across cores/steps.)
        xpad_scr[0:padr, :] = jnp.zeros((padr, D), f32)
        xpad_scr[padr + T:, :] = jnp.zeros((padr, D), f32)

        # Batch-invariant attention bias: fetched once per grid step, reused for
        # every batch element and head.
        bias_shared = bias_ref[...] if mask_mode == 1 else None

        def process(bb):
            x = x_ref[bb]                              # (T, D) f32
            xb = x.astype(bf16)

            # ---- packed QKV projection: one dense MXU pass per tensor ----
            # scale folded into q (cheaper than scaling the (T,T) scores);
            # cast to bf16 once, per-head slices are taken from the bf16 tensor.
            q_all = ((jnp.dot(xb, wq_ref[...], preferred_element_type=f32)
                      + bq_ref[...]) * scale).astype(bf16)
            k_all = (jnp.dot(xb, wk_ref[...], preferred_element_type=f32)
                     + bk_ref[...]).astype(bf16)
            v_all = (jnp.dot(xb, wv_ref[...], preferred_element_type=f32)
                     + bv_ref[...]).astype(bf16)

            if mask_mode == 2:
                bias2d = bias_ref[bb]
            else:
                bias2d = bias_shared

            heads = []
            for h in range(H):                         # H is small (static)
                qh = q_all[:, h * dk:(h + 1) * dk]
                kh = k_all[:, h * dk:(h + 1) * dk]
                vh = v_all[:, h * dv:(h + 1) * dv]
                # contract last dims of both operands -> no explicit (dk,T) transpose
                s = lax.dot_general(qh, kh, (((1,), (1,)), ((), ())),
                                    preferred_element_type=f32)     # (T, T) f32
                if bias2d is not None:
                    s = s + bias2d                     # masked_fill(-1e9) as add
                s = s - jnp.max(s, axis=-1, keepdims=True)
                e = jnp.exp(s)
                p = e * pl.reciprocal(jnp.sum(e, axis=-1, keepdims=True),
                                      approx=True)
                if emit_attn:
                    attn_ref[h, bb] = p.astype(attn_ref.dtype)
                ho = jnp.dot(p.astype(bf16), vh, preferred_element_type=f32)
                heads.append(ho.astype(bf16))

            # fc(concat(heads)) as ONE (T, H*dv) @ (H*dv, D) MXU pass.
            cat = jnp.concatenate(heads, axis=-1)      # (T, H*dv) bf16
            y = x + bfc_ref[...] + jnp.dot(cat, wfc_ref[...],
                                           preferred_element_type=f32)

            # ---- residual already added; LayerNorm in f32 ----
            mu = jnp.mean(y, axis=-1, keepdims=True)
            var = jnp.mean(jnp.square(y - mu), axis=-1, keepdims=True)
            enc = (y - mu) * lax.rsqrt(var + eps) * g_ref[...] + beta_ref[...]

            # ---- position-wise FFN (mask + zero-pad entirely in VMEM) ----
            m = npm_ref[bb]                            # (T, 1)
            ffn_in = enc * m
            xpad_scr[padr:padr + T, :] = ffn_in        # sublane-aligned store
            base = padr - pad
            acc = jnp.dot(xpad_scr[base:base + T, :].astype(bf16),
                          w1_ref[0], preferred_element_type=f32)
            for t in range(1, K):                      # Conv1d(k=9) as matmul taps
                acc = acc + jnp.dot(
                    xpad_scr[base + t:base + t + T, :].astype(bf16),
                    w1_ref[t], preferred_element_type=f32)
            hid = jnp.maximum(acc + b1_ref[...], 0.0)
            o = jnp.dot(hid.astype(bf16), w2_ref[...],
                        preferred_element_type=f32) + b2_ref[...]
            # PositionwiseFeedForward.forward never applies its layer_norm.
            out_ref[bb] = ((o + ffn_in) * m).astype(out_ref.dtype)

        if Bb == 1:
            process(0)
        else:
            # fori_loop (not a static unroll) bounds the live ranges of the big
            # f32 temporaries to a single batch element at a time.
            def body(bb, carry):
                process(bb)
                return carry
            lax.fori_loop(0, Bb, body, 0)

    return kernel


# ----------------------------------------------------------------------------
# Wrapper
# ----------------------------------------------------------------------------
_WEIGHT_KEYS = ("wq", "bq", "wk", "bk", "wv", "bv",
                "wfc", "bfc", "ln_g", "ln_b", "w1", "b1", "w2", "b2")


def fft_block_forward(x, params, *, n_head, d_k, d_v,
                      non_pad_mask=1.0, slf_attn_mask=1,
                      block_b=None, attn_dtype=jnp.bfloat16,
                      return_attn=True, ln_eps=1e-5):
    """x: (B, T, D) f32. Returns (enc_output (B,T,D), attn (n_head*B,T,T) | None)."""
    B, T, D = x.shape
    H, dk, dv = n_head, d_k, d_v
    K, Dw, d_hid = params["w1"].shape
    assert Dw == D
    pad = (K - 1) // 2
    padr = max(((pad + 7) // 8) * 8, 8)    # sublane-aligned conv halo

    # non-pad mask -> (B, T, 1) f32
    npm = jnp.broadcast_to(jnp.asarray(non_pad_mask, jnp.float32), (B, T, 1))

    # attention mask -> precomputed additive bias (0 / -1e9), bf16.
    has_attn_mask = getattr(slf_attn_mask, "ndim", 0) > 0   # scalar => identity
    mask_mode = 0
    bias = None
    if has_attn_mask:
        am = jnp.asarray(slf_attn_mask)
        bias_full = jnp.where(am != 0, -1e9, 0.0).astype(jnp.bfloat16)
        if am.ndim >= 3 and am.shape[0] != 1:
            mask_mode = 2                                    # per-batch (B,T,T)
            bias = jnp.broadcast_to(bias_full, (B, T, T))
        else:
            mask_mode = 1                                    # shared (T,T)
            if bias_full.ndim >= 3:
                bias_full = bias_full.reshape(bias_full.shape[-2:])
            bias = jnp.broadcast_to(bias_full, (T, T))

    # ---- per-generation VMEM budget ----
    vmem_cap = 64 << 20                    # conservative default (v7x-sized)
    try:
        info = pltpu.get_tpu_info()
        vmem_cap = int(getattr(info, "vmem_capacity_bytes", vmem_cap))
    except Exception:
        pass
    budget = min(vmem_cap * 3 // 4, vmem_cap - (16 << 20))   # ~48MiB / ~96MiB

    def _sub(n):
        return ((n + 7) // 8) * 8

    def _lane(n):
        return max(((n + 127) // 128) * 128, 128)

    def _tile_bytes(shape, dtype):
        itemsize = jnp.dtype(dtype).itemsize
        if len(shape) == 1:
            return _lane(shape[0]) * 8 * itemsize
        lead = 1
        for s in shape[:-2]:
            lead *= int(s)
        return lead * _sub(shape[-2]) * _lane(shape[-1]) * itemsize

    weights_bytes = sum(_tile_bytes(params[k].shape, params[k].dtype)
                        for k in _WEIGHT_KEYS)
    scratch_bytes = _tile_bytes((T + 2 * padr, D), jnp.float32)
    fixed_bytes = 2 * weights_bytes + scratch_bytes          # 2x: double buffers
    if mask_mode == 1:
        fixed_bytes += 2 * _tile_bytes((T, T), jnp.bfloat16)

    def _step_bytes(bb):
        b = _tile_bytes((bb, T, D), x.dtype)                 # x block
        b += _tile_bytes((bb, T, 1), jnp.float32)            # non-pad mask
        if mask_mode == 2:
            b += _tile_bytes((bb, T, T), jnp.bfloat16)       # attn bias block
        b += _tile_bytes((bb, T, D), x.dtype)                # enc output block
        if return_attn:
            b += _tile_bytes((H, bb, T, T), attn_dtype)      # attn output block
        return b

    if block_b is None:
        block_b = 1
        divisors = [d for d in range(1, B + 1) if B % d == 0]
        # Prefer many grid steps (pipelining + both v7x TensorCores busy),
        # then the largest batch tile whose double-buffered footprint fits.
        for min_steps in (8, 4, 2, 1):
            cands = [d for d in divisors
                     if (B // d) >= min_steps
                     and fixed_bytes + 2 * _step_bytes(d) <= budget]
            if cands:
                block_b = max(cands)
                break
    assert B % block_b == 0, "B must be divisible by block_b"
    nb = B // block_b

    vmem_limit = int(min(max(budget, fixed_bytes + 2 * _step_bytes(block_b) + (2 << 20)),
                         vmem_cap - (2 << 20)))

    kernel = _make_fft_kernel(H=H, dk=dk, dv=dv, K=K, pad=pad, padr=padr,
                              scale=1.0 / math.sqrt(dk), eps=ln_eps,
                              Bb=block_b, T=T, D=D,
                              mask_mode=mask_mode, emit_attn=return_attn)

    def _const(shape):
        zeros = (0,) * len(shape)
        return pl.BlockSpec(shape, lambda b, _z=zeros: _z)

    in_specs = [pl.BlockSpec((block_b, T, D), lambda b: (b, 0, 0)),   # x
                pl.BlockSpec((block_b, T, 1), lambda b: (b, 0, 0))]   # non-pad mask
    inputs = [x, npm]
    if mask_mode == 1:
        in_specs.append(pl.BlockSpec((T, T), lambda b: (0, 0)))       # shared bias
        inputs.append(bias)
    elif mask_mode == 2:
        in_specs.append(pl.BlockSpec((block_b, T, T), lambda b: (b, 0, 0)))
        inputs.append(bias)
    for name in _WEIGHT_KEYS:
        w = params[name]
        in_specs.append(_const(w.shape))
        inputs.append(w)

    if return_attn:
        out_shape = (jax.ShapeDtypeStruct((B, T, D), x.dtype),
                     jax.ShapeDtypeStruct((H, B, T, T), attn_dtype))
        out_specs = (pl.BlockSpec((block_b, T, D), lambda b: (b, 0, 0)),
                     pl.BlockSpec((H, block_b, T, T), lambda b: (0, b, 0, 0)))
    else:
        out_shape = jax.ShapeDtypeStruct((B, T, D), x.dtype)
        out_specs = pl.BlockSpec((block_b, T, D), lambda b: (b, 0, 0))

    results = pl.pallas_call(
        kernel,
        out_shape=out_shape,
        grid_spec=pltpu.PrefetchScalarGridSpec(
            num_scalar_prefetch=0,
            grid=(nb,),
            in_specs=in_specs,
            out_specs=out_specs,
            scratch_shapes=[pltpu.VMEM((T + 2 * padr, D), jnp.float32)]),
        compiler_params=pltpu.CompilerParams(
            dimension_semantics=("parallel",),
            vmem_limit_bytes=vmem_limit),
    )(*inputs)

    if return_attn:
        enc_out, attn = results
        # torch layout: (n_head * B, T, T), head-major (matches FastSpeech's view)
        return enc_out, attn.reshape(H * B, T, T)
    return results, None


# ----------------------------------------------------------------------------
# Pure-JAX reference (for correctness check) + parameter construction
# ----------------------------------------------------------------------------
def _reference_forward(x, params, *, n_head, d_k, d_v,
                       non_pad_mask=1.0, slf_attn_mask=1, ln_eps=1e-5):
    B, T, D = x.shape
    H, dk, dv = n_head, d_k, d_v
    f32 = jnp.float32
    p = {k: v.astype(f32) for k, v in params.items()}
    q = x @ p["wq"] + p["bq"]
    k = x @ p["wk"] + p["bk"]
    v = x @ p["wv"] + p["bv"]
    q = q.reshape(B, T, H, dk).transpose(2, 0, 1, 3)
    k = k.reshape(B, T, H, dk).transpose(2, 0, 1, 3)
    v = v.reshape(B, T, H, dv).transpose(2, 0, 1, 3)
    s = jnp.einsum("hbqd,hbkd->hbqk", q, k) / math.sqrt(dk)
    if getattr(slf_attn_mask, "ndim", 0) > 0:
        m = jnp.broadcast_to(jnp.asarray(slf_attn_mask, f32), (B, T, T))
        s = jnp.where(m[None] != 0, -1e9, s)
    attn = jax.nn.softmax(s, axis=-1)
    o = jnp.einsum("hbqk,hbkd->hbqd", attn, v)
    cat = o.transpose(1, 2, 0, 3).reshape(B, T, H * dv)
    y = cat @ p["wfc"] + p["bfc"] + x
    mu = y.mean(-1, keepdims=True)
    var = ((y - mu) ** 2).mean(-1, keepdims=True)
    enc = (y - mu) * jax.lax.rsqrt(var + ln_eps) * p["ln_g"] + p["ln_b"]
    npm = jnp.broadcast_to(jnp.asarray(non_pad_mask, f32), (B, T, 1))
    ffn_in = enc * npm
    K = p["w1"].shape[0]
    pad = (K - 1) // 2
    xp = jnp.pad(ffn_in, ((0, 0), (pad, pad), (0, 0)))
    hid = sum(jnp.einsum("btd,dh->bth", xp[:, t:t + T, :], p["w1"][t])
              for t in range(K)) + p["b1"]
    hid = jnp.maximum(hid, 0.0)
    out = (jnp.einsum("bth,hd->btd", hid, p["w2"]) + p["b2"] + ffn_in) * npm
    return out, attn.reshape(H * B, T, T)


def init_params(key, *, d_model, d_inner, n_head, d_k, d_v, kernel_size=9):
    ks = jax.random.split(key, 12)
    s = 0.1
    D, H = d_model, n_head
    bf16 = jnp.bfloat16

    def nrm(k, shape):
        return jax.random.normal(k, shape, jnp.float32) * s

    return {
        # packed head-major QKV projections (== nn.Linear(D, H*dk).weight.T), bf16
        "wq": nrm(ks[0], (D, H * d_k)).astype(bf16),
        "wk": nrm(ks[1], (D, H * d_k)).astype(bf16),
        "wv": nrm(ks[2], (D, H * d_v)).astype(bf16),
        "bq": nrm(ks[3], (1, H * d_k)),
        "bk": nrm(ks[4], (1, H * d_k)),
        "bv": nrm(ks[5], (1, H * d_v)),
        # output projection, pre-transposed for x @ W
        "wfc": nrm(ks[6], (H * d_v, D)).astype(bf16),
        "bfc": nrm(ks[7], (1, D)),
        "ln_g": jnp.ones((1, D), jnp.float32),
        "ln_b": jnp.zeros((1, D), jnp.float32),
        # conv1 (k=9): torch (d_inner, D, K) -> matmul taps (K, D, d_inner)
        "w1": jnp.transpose(nrm(ks[8], (d_inner, D, kernel_size)),
                            (2, 1, 0)).astype(bf16),
        "b1": nrm(ks[9], (1, d_inner)),
        # conv2 (k=1): torch (D, d_inner, 1) -> (d_inner, D)
        "w2": jnp.transpose(nrm(ks[10], (D, d_inner, 1))[:, :, 0], (1, 0)).astype(bf16),
        "b2": nrm(ks[11], (1, D)),
    }


if __name__ == "__main__":
    B, T = 2, 16
    d_model, d_inner = 32, 64
    n_head, d_k, d_v = 2, 16, 16

    key = jax.random.PRNGKey(0)
    kx, kp = jax.random.split(key)
    x = jax.random.normal(kx, (B, T, d_model), jnp.float32)
    params = init_params(kp, d_model=d_model, d_inner=d_inner,
                         n_head=n_head, d_k=d_k, d_v=d_v)

    fwd = jax.jit(functools.partial(fft_block_forward,
                                    n_head=n_head, d_k=d_k, d_v=d_v))
    enc_out, attn = fwd(x, params)
    jax.block_until_ready((enc_out, attn))
    assert enc_out.shape == (B, T, d_model)
    assert attn.shape == (n_head * B, T, T)
    assert bool(jnp.all(jnp.isfinite(enc_out)))
    assert bool(jnp.all(jnp.isfinite(attn.astype(jnp.float32))))

    ref_enc, ref_attn = _reference_forward(x, params, n_head=n_head,
                                           d_k=d_k, d_v=d_v)
    assert float(jnp.max(jnp.abs(enc_out - ref_enc))) < 0.1
    assert float(jnp.max(jnp.abs(attn.astype(jnp.float32) - ref_attn))) < 0.05

    # masked paths: per-batch (B,T,T) attention mask + non-trivial non_pad_mask
    npm = jnp.broadcast_to((jnp.arange(T) < 12).astype(jnp.float32)[None, :, None],
                           (B, T, 1))
    amask = jnp.broadcast_to(
        (jnp.arange(T)[None, :] > jnp.arange(T)[:, None]).astype(jnp.float32),
        (B, T, T))
    enc_m, attn_m = fft_block_forward(x, params, n_head=n_head, d_k=d_k, d_v=d_v,
                                      non_pad_mask=npm, slf_attn_mask=amask)
    jax.block_until_ready((enc_m, attn_m))
    ref_enc_m, ref_attn_m = _reference_forward(x, params, n_head=n_head,
                                               d_k=d_k, d_v=d_v,
                                               non_pad_mask=npm,
                                               slf_attn_mask=amask)
    assert float(jnp.max(jnp.abs(enc_m - ref_enc_m))) < 0.1
    assert float(jnp.max(jnp.abs(attn_m.astype(jnp.float32) - ref_attn_m))) < 0.05

    # shared (T,T) attention mask path (batch-invariant additive bias, fetched once)
    enc_s, attn_s = fft_block_forward(x, params, n_head=n_head, d_k=d_k, d_v=d_v,
                                      slf_attn_mask=amask[0])
    jax.block_until_ready((enc_s, attn_s))
    ref_enc_s, ref_attn_s = _reference_forward(x, params, n_head=n_head,
                                               d_k=d_k, d_v=d_v,
                                               slf_attn_mask=amask[0])
    assert float(jnp.max(jnp.abs(enc_s - ref_enc_s))) < 0.1
    assert float(jnp.max(jnp.abs(attn_s.astype(jnp.float32) - ref_attn_s))) < 0.05

    # attention-prob emission disabled (skips the (H,B,T,T) HBM write entirely)
    enc_na, attn_na = fft_block_forward(x, params, n_head=n_head, d_k=d_k, d_v=d_v,
                                        return_attn=False)
    jax.block_until_ready(enc_na)
    assert attn_na is None
    assert float(jnp.max(jnp.abs(enc_na - ref_enc))) < 0.1

    # batch-tile > 1 path (exercises the in-kernel fori_loop over bb)
    enc_t, attn_t = fft_block_forward(x, params, n_head=n_head, d_k=d_k, d_v=d_v,
                                      block_b=2)
    jax.block_until_ready((enc_t, attn_t))
    assert float(jnp.max(jnp.abs(enc_t - ref_enc))) < 0.1
    assert float(jnp.max(jnp.abs(attn_t.astype(jnp.float32) - ref_attn))) < 0.05

    print("KERNEL_OK")
</pallas_src>

<mosaic_0001>
module attributes {stable_mosaic.version = 11 : i64} {
  func.func @kernel(%arg0: i32, %arg1: memref<1x16x32xf32, #tpu.memory_space<vmem>>, %arg2: memref<1x16x1xf32, #tpu.memory_space<vmem>>, %arg3: memref<32x32xbf16, #tpu.memory_space<vmem>>, %arg4: memref<1x32xf32, #tpu.memory_space<vmem>>, %arg5: memref<32x32xbf16, #tpu.memory_space<vmem>>, %arg6: memref<1x32xf32, #tpu.memory_space<vmem>>, %arg7: memref<32x32xbf16, #tpu.memory_space<vmem>>, %arg8: memref<1x32xf32, #tpu.memory_space<vmem>>, %arg9: memref<32x32xbf16, #tpu.memory_space<vmem>>, %arg10: memref<1x32xf32, #tpu.memory_space<vmem>>, %arg11: memref<1x32xf32, #tpu.memory_space<vmem>>, %arg12: memref<1x32xf32, #tpu.memory_space<vmem>>, %arg13: memref<9x32x64xbf16, #tpu.memory_space<vmem>>, %arg14: memref<1x64xf32, #tpu.memory_space<vmem>>, %arg15: memref<64x32xbf16, #tpu.memory_space<vmem>>, %arg16: memref<1x32xf32, #tpu.memory_space<vmem>>, %arg17: memref<1x16x32xf32, #tpu.memory_space<vmem>>, %arg18: memref<2x1x16x16xbf16, #tpu.memory_space<vmem>>, %arg19: memref<32x32xf32, #tpu.memory_space<vmem>>) attributes {dimension_semantics = [#tpu.dimension_semantics<parallel>], iteration_bounds = array<i64: 2>, scalar_prefetch = 0 : i64, scratch_operands = 1 : i64, tpu.core_type = #tpu.core_type<tc>, window_params = [{transform_indices = @transform_0, window_bounds = array<i64: 1, 16, 32>}, {transform_indices = @transform_1, window_bounds = array<i64: 1, 16, 1>}, {pipeline_mode = #tpu.pipeline_mode<synchronous>, transform_indices = @transform_2, window_bounds = array<i64: 32, 32>}, {pipeline_mode = #tpu.pipeline_mode<synchronous>, transform_indices = @transform_3, window_bounds = array<i64: 1, 32>}, {pipeline_mode = #tpu.pipeline_mode<synchronous>, transform_indices = @transform_4, window_bounds = array<i64: 32, 32>}, {pipeline_mode = #tpu.pipeline_mode<synchronous>, transform_indices = @transform_5, window_bounds = array<i64: 1, 32>}, {pipeline_mode = #tpu.pipeline_mode<synchronous>, transform_indices = @transform_6, window_bounds = array<i64: 32, 32>}, {pipeline_mode = #tpu.pipeline_mode<synchronous>, transform_indices = @transform_7, window_bounds = array<i64: 1, 32>}, {pipeline_mode = #tpu.pipeline_mode<synchronous>, transform_indices = @transform_8, window_bounds = array<i64: 32, 32>}, {pipeline_mode = #tpu.pipeline_mode<synchronous>, transform_indices = @transform_9, window_bounds = array<i64: 1, 32>}, {pipeline_mode = #tpu.pipeline_mode<synchronous>, transform_indices = @transform_10, window_bounds = array<i64: 1, 32>}, {pipeline_mode = #tpu.pipeline_mode<synchronous>, transform_indices = @transform_11, window_bounds = array<i64: 1, 32>}, {pipeline_mode = #tpu.pipeline_mode<synchronous>, transform_indices = @transform_12, window_bounds = array<i64: 9, 32, 64>}, {pipeline_mode = #tpu.pipeline_mode<synchronous>, transform_indices = @transform_13, window_bounds = array<i64: 1, 64>}, {pipeline_mode = #tpu.pipeline_mode<synchronous>, transform_indices = @transform_14, window_bounds = array<i64: 64, 32>}, {pipeline_mode = #tpu.pipeline_mode<synchronous>, transform_indices = @transform_15, window_bounds = array<i64: 1, 32>}, {transform_indices = @transform_16, window_bounds = array<i64: 1, 16, 32>}, {transform_indices = @transform_17, window_bounds = array<i64: 2, 1, 16, 16>}]} {
    %cst = arith.constant 0.000000e+00 : f32
    %0 = vector.broadcast %cst : f32 to vector<8x32xf32>
    %c0 = arith.constant 0 : index
    %c0_0 = arith.constant 0 : index
    %1 = vector.load %arg19[%c0, %c0_0] : memref<32x32xf32, #tpu.memory_space<vmem>>, vector<8x32xf32>
    tpu.vector_store %arg19[%c0, %c0_0], %0 {strides = array<i32>} : memref<32x32xf32, #tpu.memory_space<vmem>>, vector<8x32xf32>,
    %cst_1 = arith.constant 0.000000e+00 : f32
    %2 = vector.broadcast %cst_1 : f32 to vector<8x32xf32>
    %c24 = arith.constant 24 : index
    %c0_2 = arith.constant 0 : index
    %3 = vector.load %arg19[%c24, %c0_2] : memref<32x32xf32, #tpu.memory_space<vmem>>, vector<8x32xf32>
    tpu.vector_store %arg19[%c24, %c0_2], %2 {strides = array<i32>} : memref<32x32xf32, #tpu.memory_space<vmem>>, vector<8x32xf32>,
    %c0_3 = arith.constant 0 : index
    %c0_4 = arith.constant 0 : index
    %c0_5 = arith.constant 0 : index
    %4 = vector.load %arg1[%c0_3, %c0_4, %c0_5] : memref<1x16x32xf32, #tpu.memory_space<vmem>>, vector<1x16x32xf32>
    %5 = vector.shape_cast %4 : vector<1x16x32xf32> to vector<16x32xf32>
    %6 = arith.truncf %5 : vector<16x32xf32> to vector<16x32xbf16>
    %c0_6 = arith.constant 0 : index
    %c0_7 = arith.constant 0 : index
    %7 = vector.load %arg3[%c0_6, %c0_7] : memref<32x32xbf16, #tpu.memory_space<vmem>>, vector<32x32xbf16>
    %cst_8 = arith.constant dense<0.000000e+00> : vector<16x32xf32>
    %8 = tpu.matmul %6, %7, %cst_8 {dimension_numbers = #tpu.dot_dimension_numbers<[1], [0], [0], [1], [0, 0, 1, 1], [], []>} : vector<16x32xbf16>, vector<32x32xbf16>, vector<16x32xf32> -> vector<16x32xf32>
    %c0_9 = arith.constant 0 : index
    %c0_10 = arith.constant 0 : index
    %9 = vector.load %arg4[%c0_9, %c0_10] : memref<1x32xf32, #tpu.memory_space<vmem>>, vector<1x32xf32>
    %10 = vector.broadcast %9 : vector<1x32xf32> to vector<16x32xf32>
    %11 = arith.addf %8, %10 : vector<16x32xf32>
    %cst_11 = arith.constant 2.500000e-01 : f32
    %12 = vector.broadcast %cst_11 : f32 to vector<16x32xf32>
    %13 = arith.mulf %11, %12 : vector<16x32xf32>
    %14 = arith.truncf %13 : vector<16x32xf32> to vector<16x32xbf16>
    %c0_12 = arith.constant 0 : index
    %c0_13 = arith.constant 0 : index
    %15 = vector.load %arg5[%c0_12, %c0_13] : memref<32x32xbf16, #tpu.memory_space<vmem>>, vector<32x32xbf16>
    %cst_14 = arith.constant dense<0.000000e+00> : vector<16x32xf32>
    %16 = tpu.matmul %6, %15, %cst_14 {dimension_numbers = #tpu.dot_dimension_numbers<[1], [0], [0], [1], [0, 0, 1, 1], [], []>} : vector<16x32xbf16>, vector<32x32xbf16>, vector<16x32xf32> -> vector<16x32xf32>
    %c0_15 = arith.constant 0 : index
    %c0_16 = arith.constant 0 : index
    %17 = vector.load %arg6[%c0_15, %c0_16] : memref<1x32xf32, #tpu.memory_space<vmem>>, vector<1x32xf32>
    %18 = vector.broadcast %17 : vector<1x32xf32> to vector<16x32xf32>
    %19 = arith.addf %16, %18 : vector<16x32xf32>
    %20 = arith.truncf %19 : vector<16x32xf32> to vector<16x32xbf16>
    %c0_17 = arith.constant 0 : index
    %c0_18 = arith.constant 0 : index
    %21 = vector.load %arg7[%c0_17, %c0_18] : memref<32x32xbf16, #tpu.memory_space<vmem>>, vector<32x32xbf16>
    %cst_19 = arith.constant dense<0.000000e+00> : vector<16x32xf32>
    %22 = tpu.matmul %6, %21, %cst_19 {dimension_numbers = #tpu.dot_dimension_numbers<[1], [0], [0], [1], [0, 0, 1, 1], [], []>} : vector<16x32xbf16>, vector<32x32xbf16>, vector<16x32xf32> -> vector<16x32xf32>
    %c0_20 = arith.constant 0 : index
    %c0_21 = arith.constant 0 : index
    %23 = vector.load %arg8[%c0_20, %c0_21] : memref<1x32xf32, #tpu.memory_space<vmem>>, vector<1x32xf32>
    %24 = vector.broadcast %23 : vector<1x32xf32> to vector<16x32xf32>
    %25 = arith.addf %22, %24 : vector<16x32xf32>
    %26 = arith.truncf %25 : vector<16x32xf32> to vector<16x32xbf16>
    %27 = vector.extract_strided_slice %14 {offsets = [0, 0], sizes = [16, 16], strides = [1, 1]} : vector<16x32xbf16> to vector<16x16xbf16>
    %28 = vector.extract_strided_slice %20 {offsets = [0, 0], sizes = [16, 16], strides = [1, 1]} : vector<16x32xbf16> to vector<16x16xbf16>
    %29 = vector.extract_strided_slice %26 {offsets = [0, 0], sizes = [16, 16], strides = [1, 1]} : vector<16x32xbf16> to vector<16x16xbf16>
    %cst_22 = arith.constant dense<0.000000e+00> : vector<16x16xf32>
    %30 = tpu.matmul %27, %28, %cst_22 {dimension_numbers = #tpu.dot_dimension_numbers<[1], [1], [0], [0], [0, 0, 1, 0], [], []>} : vector<16x16xbf16>, vector<16x16xbf16>, vector<16x16xf32> -> vector<16x16xf32>
    %cst_23 = arith.constant dense<0xFF800000> : vector<16xf32>
    %31 = vector.multi_reduction <maximumf>, %30, %cst_23 [1] : vector<16x16xf32> to vector<16xf32>
    %32 = vector.shape_cast %31 : vector<16xf32> to vector<16x1xf32>
    %33 = vector.broadcast %32 : vector<16x1xf32> to vector<16x16xf32>
    %34 = arith.subf %30, %33 : vector<16x16xf32>
    %35 = math.exp %34 : vector<16x16xf32>
    %cst_24 = arith.constant dense<0.000000e+00> : vector<16xf32>
    %36 = vector.multi_reduction <add>, %35, %cst_24 [1] : vector<16x16xf32> to vector<16xf32>
    %37 = vector.shape_cast %36 : vector<16xf32> to vector<16x1xf32>
    %38 = tpu.reciprocal %37 {approx = true} : vector<16x1xf32> -> vector<16x1xf32>
    %39 = vector.broadcast %38 : vector<16x1xf32> to vector<16x16xf32>
    %40 = arith.mulf %35, %39 : vector<16x16xf32>
    %41 = arith.truncf %40 : vector<16x16xf32> to vector<16x16xbf16>
    %c0_25 = arith.constant 0 : index
    %c0_26 = arith.constant 0 : index
    %c0_27 = arith.constant 0 : index
    %c0_28 = arith.constant 0 : index
    %42 = vector.load %arg18[%c0_25, %c0_26, %c0_27, %c0_28] : memref<2x1x16x16xbf16, #tpu.memory_space<vmem>>, vector<1x1x16x16xbf16>
    %43 = vector.shape_cast %42 : vector<1x1x16x16xbf16> to vector<16x16xbf16>
    %44 = vector.shape_cast %41 : vector<16x16xbf16> to vector<1x1x16x16xbf16>
    tpu.vector_store %arg18[%c0_25, %c0_26, %c0_27, %c0_28], %44 {strides = array<i32>} : memref<2x1x16x16xbf16, #tpu.memory_space<vmem>>, vector<1x1x16x16xbf16>,
    %45 = arith.truncf %40 : vector<16x16xf32> to vector<16x16xbf16>
    %cst_29 = arith.constant dense<0.000000e+00> : vector<16x16xf32>
    %46 = tpu.matmul %45, %29, %cst_29 {dimension_numbers = #tpu.dot_dimension_numbers<[1], [0], [0], [1], [0, 0, 1, 1], [], []>} : vector<16x16xbf16>, vector<16x16xbf16>, vector<16x16xf32> -> vector<16x16xf32>
    %47 = arith.truncf %46 : vector<16x16xf32> to vector<16x16xbf16>
    %48 = vector.extract_strided_slice %14 {offsets = [0, 16], sizes = [16, 16], strides = [1, 1]} : vector<16x32xbf16> to vector<16x16xbf16>
    %49 = vector.extract_strided_slice %20 {offsets = [0, 16], sizes = [16, 16], strides = [1, 1]} : vector<16x32xbf16> to vector<16x16xbf16>
    %50 = vector.extract_strided_slice %26 {offsets = [0, 16], sizes = [16, 16], strides = [1, 1]} : vector<16x32xbf16> to vector<16x16xbf16>
    %cst_30 = arith.constant dense<0.000000e+00> : vector<16x16xf32>
    %51 = tpu.matmul %48, %49, %cst_30 {dimension_numbers = #tpu.dot_dimension_numbers<[1], [1], [0], [0], [0, 0, 1, 0], [], []>} : vector<16x16xbf16>, vector<16x16xbf16>, vector<16x16xf32> -> vector<16x16xf32>
    %cst_31 = arith.constant dense<0xFF800000> : vector<16xf32>
    %52 = vector.multi_reduction <maximumf>, %51, %cst_31 [1] : vector<16x16xf32> to vector<16xf32>
    %53 = vector.shape_cast %52 : vector<16xf32> to vector<16x1xf32>
    %54 = vector.broadcast %53 : vector<16x1xf32> to vector<16x16xf32>
    %55 = arith.subf %51, %54 : vector<16x16xf32>
    %56 = math.exp %55 : vector<16x16xf32>
    %cst_32 = arith.constant dense<0.000000e+00> : vector<16xf32>
    %57 = vector.multi_reduction <add>, %56, %cst_32 [1] : vector<16x16xf32> to vector<16xf32>
    %58 = vector.shape_cast %57 : vector<16xf32> to vector<16x1xf32>
    %59 = tpu.reciprocal %58 {approx = true} : vector<16x1xf32> -> vector<16x1xf32>
    %60 = vector.broadcast %59 : vector<16x1xf32> to vector<16x16xf32>
    %61 = arith.mulf %56, %60 : vector<16x16xf32>
    %62 = arith.truncf %61 : vector<16x16xf32> to vector<16x16xbf16>
    %c1 = arith.constant 1 : index
    %c0_33 = arith.constant 0 : index
    %c0_34 = arith.constant 0 : index
    %c0_35 = arith.constant 0 : index
    %63 = vector.load %arg18[%c1, %c0_33, %c0_34, %c0_35] : memref<2x1x16x16xbf16, #tpu.memory_space<vmem>>, vector<1x1x16x16xbf16>
    %64 = vector.shape_cast %63 : vector<1x1x16x16xbf16> to vector<16x16xbf16>
    %65 = vector.shape_cast %62 : vector<16x16xbf16> to vector<1x1x16x16xbf16>
    tpu.vector_store %arg18[%c1, %c0_33, %c0_34, %c0_35], %65 {strides = array<i32>} : memref<2x1x16x16xbf16, #tpu.memory_space<vmem>>, vector<1x1x16x16xbf16>,
    %66 = arith.truncf %61 : vector<16x16xf32> to vector<16x16xbf16>
    %cst_36 = arith.constant dense<0.000000e+00> : vector<16x16xf32>
    %67 = tpu.matmul %66, %50, %cst_36 {dimension_numbers = #tpu.dot_dimension_numbers<[1], [0], [0], [1], [0, 0, 1, 1], [], []>} : vector<16x16xbf16>, vector<16x16xbf16>, vector<16x16xf32> -> vector<16x16xf32>
    %68 = arith.truncf %67 : vector<16x16xf32> to vector<16x16xbf16>
    %69 = tpu.concatenate %47, %68 in 1 : vector<16x16xbf16>, vector<16x16xbf16> -> vector<16x32xbf16>
    %c0_37 = arith.constant 0 : index
    %c0_38 = arith.constant 0 : index
    %70 = vector.load %arg10[%c0_37, %c0_38] : memref<1x32xf32, #tpu.memory_space<vmem>>, vector<1x32xf32>
    %71 = vector.broadcast %70 : vector<1x32xf32> to vector<16x32xf32>
    %72 = arith.addf %5, %71 : vector<16x32xf32>
    %c0_39 = arith.constant 0 : index
    %c0_40 = arith.constant 0 : index
    %73 = vector.load %arg9[%c0_39, %c0_40] : memref<32x32xbf16, #tpu.memory_space<vmem>>, vector<32x32xbf16>
    %cst_41 = arith.constant dense<0.000000e+00> : vector<16x32xf32>
    %74 = tpu.matmul %69, %73, %cst_41 {dimension_numbers = #tpu.dot_dimension_numbers<[1], [0], [0], [1], [0, 0, 1, 1], [], []>} : vector<16x32xbf16>, vector<32x32xbf16>, vector<16x32xf32> -> vector<16x32xf32>
    %75 = arith.addf %72, %74 : vector<16x32xf32>
    %cst_42 = arith.constant dense<0.000000e+00> : vector<16xf32>
    %76 = vector.multi_reduction <add>, %75, %cst_42 [1] : vector<16x32xf32> to vector<16xf32>
    %77 = vector.shape_cast %76 : vector<16xf32> to vector<16x1xf32>
    %cst_43 = arith.constant 3.200000e+01 : f32
    %78 = vector.broadcast %cst_43 : f32 to vector<16x1xf32>
    %79 = arith.divf %77, %78 : vector<16x1xf32>
    %80 = vector.broadcast %79 : vector<16x1xf32> to vector<16x32xf32>
    %81 = arith.subf %75, %80 : vector<16x32xf32>
    %82 = arith.mulf %81, %81 : vector<16x32xf32>
    %cst_44 = arith.constant dense<0.000000e+00> : vector<16xf32>
    %83 = vector.multi_reduction <add>, %82, %cst_44 [1] : vector<16x32xf32> to vector<16xf32>
    %84 = vector.shape_cast %83 : vector<16xf32> to vector<16x1xf32>
    %cst_45 = arith.constant 3.200000e+01 : f32
    %85 = vector.broadcast %cst_45 : f32 to vector<16x1xf32>
    %86 = arith.divf %84, %85 : vector<16x1xf32>
    %87 = vector.broadcast %79 : vector<16x1xf32> to vector<16x32xf32>
    %88 = arith.subf %75, %87 : vector<16x32xf32>
    %cst_46 = arith.constant 9.99999974E-6 : f32
    %89 = vector.broadcast %cst_46 : f32 to vector<16x1xf32>
    %90 = arith.addf %86, %89 : vector<16x1xf32>
    %91 = math.rsqrt %90 : vector<16x1xf32>
    %92 = vector.broadcast %91 : vector<16x1xf32> to vector<16x32xf32>
    %93 = arith.mulf %88, %92 : vector<16x32xf32>
    %c0_47 = arith.constant 0 : index
    %c0_48 = arith.constant 0 : index
    %94 = vector.load %arg11[%c0_47, %c0_48] : memref<1x32xf32, #tpu.memory_space<vmem>>, vector<1x32xf32>
    %95 = vector.broadcast %94 : vector<1x32xf32> to vector<16x32xf32>
    %96 = arith.mulf %93, %95 : vector<16x32xf32>
    %c0_49 = arith.constant 0 : index
    %c0_50 = arith.constant 0 : index
    %97 = vector.load %arg12[%c0_49, %c0_50] : memref<1x32xf32, #tpu.memory_space<vmem>>, vector<1x32xf32>
    %98 = vector.broadcast %97 : vector<1x32xf32> to vector<16x32xf32>
    %99 = arith.addf %96, %98 : vector<16x32xf32>
    %c0_51 = arith.constant 0 : index
    %c0_52 = arith.constant 0 : index
    %c0_53 = arith.constant 0 : index
    %100 = vector.load %arg2[%c0_51, %c0_52, %c0_53] : memref<1x16x1xf32, #tpu.memory_space<vmem>>, vector<1x16x1xf32>
    %101 = vector.shape_cast %100 : vector<1x16x1xf32> to vector<16x1xf32>
    %102 = vector.broadcast %101 : vector<16x1xf32> to vector<16x32xf32>
    %103 = arith.mulf %99, %102 : vector<16x32xf32>
    %c8 = arith.constant 8 : index
    %c0_54 = arith.constant 0 : index
    %104 = vector.load %arg19[%c8, %c0_54] : memref<32x32xf32, #tpu.memory_space<vmem>>, vector<16x32xf32>
    tpu.vector_store %arg19[%c8, %c0_54], %103 {strides = array<i32>} : memref<32x32xf32, #tpu.memory_space<vmem>>, vector<16x32xf32>,
    %c4 = arith.constant 4 : index
    %c0_55 = arith.constant 0 : index
    %105 = vector.load %arg19[%c4, %c0_55] : memref<32x32xf32, #tpu.memory_space<vmem>>, vector<16x32xf32>
    %106 = arith.truncf %105 : vector<16x32xf32> to vector<16x32xbf16>
    %c0_56 = arith.constant 0 : index
    %c0_57 = arith.constant 0 : index
    %c0_58 = arith.constant 0 : index
    %107 = vector.load %arg13[%c0_56, %c0_57, %c0_58] : memref<9x32x64xbf16, #tpu.memory_space<vmem>>, vector<1x32x64xbf16>
    %108 = vector.shape_cast %107 : vector<1x32x64xbf16> to vector<32x64xbf16>
    %cst_59 = arith.constant dense<0.000000e+00> : vector<16x64xf32>
    %109 = tpu.matmul %106, %108, %cst_59 {dimension_numbers = #tpu.dot_dimension_numbers<[1], [0], [0], [1], [0, 0, 1, 1], [], []>} : vector<16x32xbf16>, vector<32x64xbf16>, vector<16x64xf32> -> vector<16x64xf32>
    %c5 = arith.constant 5 : index
    %c0_60 = arith.constant 0 : index
    %110 = vector.load %arg19[%c5, %c0_60] : memref<32x32xf32, #tpu.memory_space<vmem>>, vector<16x32xf32>
    %111 = arith.truncf %110 : vector<16x32xf32> to vector<16x32xbf16>
    %c1_61 = arith.constant 1 : index
    %c0_62 = arith.constant 0 : index
    %c0_63 = arith.constant 0 : index
    %112 = vector.load %arg13[%c1_61, %c0_62, %c0_63] : memref<9x32x64xbf16, #tpu.memory_space<vmem>>, vector<1x32x64xbf16>
    %113 = vector.shape_cast %112 : vector<1x32x64xbf16> to vector<32x64xbf16>
    %cst_64 = arith.constant dense<0.000000e+00> : vector<16x64xf32>
    %114 = tpu.matmul %111, %113, %cst_64 {dimension_numbers = #tpu.dot_dimension_numbers<[1], [0], [0], [1], [0, 0, 1, 1], [], []>} : vector<16x32xbf16>, vector<32x64xbf16>, vector<16x64xf32> -> vector<16x64xf32>
    %115 = arith.addf %109, %114 : vector<16x64xf32>
    %c6 = arith.constant 6 : index
    %c0_65 = arith.constant 0 : index
    %116 = vector.load %arg19[%c6, %c0_65] : memref<32x32xf32, #tpu.memory_space<vmem>>, vector<16x32xf32>
    %117 = arith.truncf %116 : vector<16x32xf32> to vector<16x32xbf16>
    %c2 = arith.constant 2 : index
    %c0_66 = arith.constant 0 : index
    %c0_67 = arith.constant 0 : index
    %118 = vector.load %arg13[%c2, %c0_66, %c0_67] : memref<9x32x64xbf16, #tpu.memory_space<vmem>>, vector<1x32x64xbf16>
    %119 = vector.shape_cast %118 : vector<1x32x64xbf16> to vector<32x64xbf16>
    %cst_68 = arith.constant dense<0.000000e+00> : vector<16x64xf32>
    %120 = tpu.matmul %117, %119, %cst_68 {dimension_numbers = #tpu.dot_dimension_numbers<[1], [0], [0], [1], [0, 0, 1, 1], [], []>} : vector<16x32xbf16>, vector<32x64xbf16>, vector<16x64xf32> -> vector<16x64xf32>
    %121 = arith.addf %115, %120 : vector<16x64xf32>
    %c7 = arith.constant 7 : index
    %c0_69 = arith.constant 0 : index
    %122 = vector.load %arg19[%c7, %c0_69] : memref<32x32xf32, #tpu.memory_space<vmem>>, vector<16x32xf32>
    %123 = arith.truncf %122 : vector<16x32xf32> to vector<16x32xbf16>
    %c3 = arith.constant 3 : index
    %c0_70 = arith.constant 0 : index
    %c0_71 = arith.constant 0 : index
    %124 = vector.load %arg13[%c3, %c0_70, %c0_71] : memref<9x32x64xbf16, #tpu.memory_space<vmem>>, vector<1x32x64xbf16>
    %125 = vector.shape_cast %124 : vector<1x32x64xbf16> to vector<32x64xbf16>
    %cst_72 = arith.constant dense<0.000000e+00> : vector<16x64xf32>
    %126 = tpu.matmul %123, %125, %cst_72 {dimension_numbers = #tpu.dot_dimension_numbers<[1], [0], [0], [1], [0, 0, 1, 1], [], []>} : vector<16x32xbf16>, vector<32x64xbf16>, vector<16x64xf32> -> vector<16x64xf32>
    %127 = arith.addf %121, %126 : vector<16x64xf32>
    %c8_73 = arith.constant 8 : index
    %c0_74 = arith.constant 0 : index
    %128 = vector.load %arg19[%c8_73, %c0_74] : memref<32x32xf32, #tpu.memory_space<vmem>>, vector<16x32xf32>
    %129 = arith.truncf %128 : vector<16x32xf32> to vector<16x32xbf16>
    %c4_75 = arith.constant 4 : index
    %c0_76 = arith.constant 0 : index
    %c0_77 = arith.constant 0 : index
    %130 = vector.load %arg13[%c4_75, %c0_76, %c0_77] : memref<9x32x64xbf16, #tpu.memory_space<vmem>>, vector<1x32x64xbf16>
    %131 = vector.shape_cast %130 : vector<1x32x64xbf16> to vector<32x64xbf16>
    %cst_78 = arith.constant dense<0.000000e+00> : vector<16x64xf32>
    %132 = tpu.matmul %129, %131, %cst_78 {dimension_numbers = #tpu.dot_dimension_numbers<[1], [0], [0], [1], [0, 0, 1, 1], [], []>} : vector<16x32xbf16>, vector<32x64xbf16>, vector<16x64xf32> -> vector<16x64xf32>
    %133 = arith.addf %127, %132 : vector<16x64xf32>
    %c9 = arith.constant 9 : index
    %c0_79 = arith.constant 0 : index
    %134 = vector.load %arg19[%c9, %c0_79] : memref<32x32xf32, #tpu.memory_space<vmem>>, vector<16x32xf32>
    %135 = arith.truncf %134 : vector<16x32xf32> to vector<16x32xbf16>
    %c5_80 = arith.constant 5 : index
    %c0_81 = arith.constant 0 : index
    %c0_82 = arith.constant 0 : index
    %136 = vector.load %arg13[%c5_80, %c0_81, %c0_82] : memref<9x32x64xbf16, #tpu.memory_space<vmem>>, vector<1x32x64xbf16>
    %137 = vector.shape_cast %136 : vector<1x32x64xbf16> to vector<32x64xbf16>
    %cst_83 = arith.constant dense<0.000000e+00> : vector<16x64xf32>
    %138 = tpu.matmul %135, %137, %cst_83 {dimension_numbers = #tpu.dot_dimension_numbers<[1], [0], [0], [1], [0, 0, 1, 1], [], []>} : vector<16x32xbf16>, vector<32x64xbf16>, vector<16x64xf32> -> vector<16x64xf32>
    %139 = arith.addf %133, %138 : vector<16x64xf32>
    %c10 = arith.constant 10 : index
    %c0_84 = arith.constant 0 : index
    %140 = vector.load %arg19[%c10, %c0_84] : memref<32x32xf32, #tpu.memory_space<vmem>>, vector<16x32xf32>
    %141 = arith.truncf %140 : vector<16x32xf32> to vector<16x32xbf16>
    %c6_85 = arith.constant 6 : index
    %c0_86 = arith.constant 0 : index
    %c0_87 = arith.constant 0 : index
    %142 = vector.load %arg13[%c6_85, %c0_86, %c0_87] : memref<9x32x64xbf16, #tpu.memory_space<vmem>>, vector<1x32x64xbf16>
    %143 = vector.shape_cast %142 : vector<1x32x64xbf16> to vector<32x64xbf16>
    %cst_88 = arith.constant dense<0.000000e+00> : vector<16x64xf32>
    %144 = tpu.matmul %141, %143, %cst_88 {dimension_numbers = #tpu.dot_dimension_numbers<[1], [0], [0], [1], [0, 0, 1, 1], [], []>} : vector<16x32xbf16>, vector<32x64xbf16>, vector<16x64xf32> -> vector<16x64xf32>
    %145 = arith.addf %139, %144 : vector<16x64xf32>
    %c11 = arith.constant 11 : index
    %c0_89 = arith.constant 0 : index
    %146 = vector.load %arg19[%c11, %c0_89] : memref<32x32xf32, #tpu.memory_space<vmem>>, vector<16x32xf32>
    %147 = arith.truncf %146 : vector<16x32xf32> to vector<16x32xbf16>
    %c7_90 = arith.constant 7 : index
    %c0_91 = arith.constant 0 : index
    %c0_92 = arith.constant 0 : index
    %148 = vector.load %arg13[%c7_90, %c0_91, %c0_92] : memref<9x32x64xbf16, #tpu.memory_space<vmem>>, vector<1x32x64xbf16>
    %149 = vector.shape_cast %148 : vector<1x32x64xbf16> to vector<32x64xbf16>
    %cst_93 = arith.constant dense<0.000000e+00> : vector<16x64xf32>
    %150 = tpu.matmul %147, %149, %cst_93 {dimension_numbers = #tpu.dot_dimension_numbers<[1], [0], [0], [1], [0, 0, 1, 1], [], []>} : vector<16x32xbf16>, vector<32x64xbf16>, vector<16x64xf32> -> vector<16x64xf32>
    %151 = arith.addf %145, %150 : vector<16x64xf32>
    %c12 = arith.constant 12 : index
    %c0_94 = arith.constant 0 : index
    %152 = vector.load %arg19[%c12, %c0_94] : memref<32x32xf32, #tpu.memory_space<vmem>>, vector<16x32xf32>
    %153 = arith.truncf %152 : vector<16x32xf32> to vector<16x32xbf16>
    %c8_95 = arith.constant 8 : index
    %c0_96 = arith.constant 0 : index
    %c0_97 = arith.constant 0 : index
    %154 = vector.load %arg13[%c8_95, %c0_96, %c0_97] : memref<9x32x64xbf16, #tpu.memory_space<vmem>>, vector<1x32x64xbf16>
    %155 = vector.shape_cast %154 : vector<1x32x64xbf16> to vector<32x64xbf16>
    %cst_98 = arith.constant dense<0.000000e+00> : vector<16x64xf32>
    %156 = tpu.matmul %153, %155, %cst_98 {dimension_numbers = #tpu.dot_dimension_numbers<[1], [0], [0], [1], [0, 0, 1, 1], [], []>} : vector<16x32xbf16>, vector<32x64xbf16>, vector<16x64xf32> -> vector<16x64xf32>
    %157 = arith.addf %151, %156 : vector<16x64xf32>
    %c0_99 = arith.constant 0 : index
    %c0_100 = arith.constant 0 : index
    %158 = vector.load %arg14[%c0_99, %c0_100] : memref<1x64xf32, #tpu.memory_space<vmem>>, vector<1x64xf32>
    %159 = vector.broadcast %158 : vector<1x64xf32> to vector<16x64xf32>
    %160 = arith.addf %157, %159 : vector<16x64xf32>
    %cst_101 = arith.constant 0.000000e+00 : f32
    %161 = vector.broadcast %cst_101 : f32 to vector<16x64xf32>
    %162 = arith.maximumf %160, %161 : vector<16x64xf32>
    %163 = arith.truncf %162 : vector<16x64xf32> to vector<16x64xbf16>
    %c0_102 = arith.constant 0 : index
    %c0_103 = arith.constant 0 : index
    %164 = vector.load %arg15[%c0_102, %c0_103] : memref<64x32xbf16, #tpu.memory_space<vmem>>, vector<64x32xbf16>
    %cst_104 = arith.constant dense<0.000000e+00> : vector<16x32xf32>
    %165 = tpu.matmul %163, %164, %cst_104 {dimension_numbers = #tpu.dot_dimension_numbers<[1], [0], [0], [1], [0, 0, 1, 1], [], []>} : vector<16x64xbf16>, vector<64x32xbf16>, vector<16x32xf32> -> vector<16x32xf32>
    %c0_105 = arith.constant 0 : index
    %c0_106 = arith.constant 0 : index
    %166 = vector.load %arg16[%c0_105, %c0_106] : memref<1x32xf32, #tpu.memory_space<vmem>>, vector<1x32xf32>
    %167 = vector.broadcast %166 : vector<1x32xf32> to vector<16x32xf32>
    %168 = arith.addf %165, %167 : vector<16x32xf32>
    %169 = arith.addf %168, %103 : vector<16x32xf32>
    %170 = vector.broadcast %101 : vector<16x1xf32> to vector<16x32xf32>
    %171 = arith.mulf %169, %170 : vector<16x32xf32>
    %c0_107 = arith.constant 0 : index
    %c0_108 = arith.constant 0 : index
    %c0_109 = arith.constant 0 : index
    %172 = vector.load %arg17[%c0_107, %c0_108, %c0_109] : memref<1x16x32xf32, #tpu.memory_space<vmem>>, vector<1x16x32xf32>
    %173 = vector.shape_cast %172 : vector<1x16x32xf32> to vector<16x32xf32>
    %174 = vector.shape_cast %171 : vector<16x32xf32> to vector<1x16x32xf32>
    tpu.vector_store %arg17[%c0_107, %c0_108, %c0_109], %174 {strides = array<i32>} : memref<1x16x32xf32, #tpu.memory_space<vmem>>, vector<1x16x32xf32>,
    return
  }
  func.func @transform_0(%arg0: i32) -> (i32, i32, i32) {
    %c0_i32 = arith.constant 0 : i32
    %c0_i32_0 = arith.constant 0 : i32
    %c0_i32_1 = arith.constant 0 : i32
    return %arg0, %c0_i32, %c0_i32_0 : i32, i32, i32
  }
  func.func @transform_1(%arg0: i32) -> (i32, i32, i32) {
    %c0_i32 = arith.constant 0 : i32
    %c0_i32_0 = arith.constant 0 : i32
    %c0_i32_1 = arith.constant 0 : i32
    return %arg0, %c0_i32, %c0_i32_0 : i32, i32, i32
  }
  func.func @transform_2(%arg0: i32) -> (i32, i32) {
    %c0_i32 = arith.constant 0 : i32
    %c0_i32_0 = arith.constant 0 : i32
    %c0_i32_1 = arith.constant 0 : i32
    return %c0_i32, %c0_i32_0 : i32, i32
  }
  func.func @transform_3(%arg0: i32) -> (i32, i32) {
    %c0_i32 = arith.constant 0 : i32
    %c0_i32_0 = arith.constant 0 : i32
    %c0_i32_1 = arith.constant 0 : i32
    return %c0_i32, %c0_i32_0 : i32, i32
  }
  func.func @transform_4(%arg0: i32) -> (i32, i32) {
    %c0_i32 = arith.constant 0 : i32
    %c0_i32_0 = arith.constant 0 : i32
    %c0_i32_1 = arith.constant 0 : i32
    return %c0_i32, %c0_i32_0 : i32, i32
  }
  func.func @transform_5(%arg0: i32) -> (i32, i32) {
    %c0_i32 = arith.constant 0 : i32
    %c0_i32_0 = arith.constant 0 : i32
    %c0_i32_1 = arith.constant 0 : i32
    return %c0_i32, %c0_i32_0 : i32, i32
  }
  func.func @transform_6(%arg0: i32) -> (i32, i32) {
    %c0_i32 = arith.constant 0 : i32
    %c0_i32_0 = arith.constant 0 : i32
    %c0_i32_1 = arith.constant 0 : i32
    return %c0_i32, %c0_i32_0 : i32, i32
  }
  func.func @transform_7(%arg0: i32) -> (i32, i32) {
    %c0_i32 = arith.constant 0 : i32
    %c0_i32_0 = arith.constant 0 : i32
    %c0_i32_1 = arith.constant 0 : i32
    return %c0_i32, %c0_i32_0 : i32, i32
  }
  func.func @transform_8(%arg0: i32) -> (i32, i32) {
    %c0_i32 = arith.constant 0 : i32
    %c0_i32_0 = arith.constant 0 : i32
    %c0_i32_1 = arith.constant 0 : i32
    return %c0_i32, %c0_i32_0 : i32, i32
  }
  func.func @transform_9(%arg0: i32) -> (i32, i32) {
    %c0_i32 = arith.constant 0 : i32
    %c0_i32_0 = arith.constant 0 : i32
    %c0_i32_1 = arith.constant 0 : i32
    return %c0_i32, %c0_i32_0 : i32, i32
  }
  func.func @transform_10(%arg0: i32) -> (i32, i32) {
    %c0_i32 = arith.constant 0 : i32
    %c0_i32_0 = arith.constant 0 : i32
    %c0_i32_1 = arith.constant 0 : i32
    return %c0_i32, %c0_i32_0 : i32, i32
  }
  func.func @transform_11(%arg0: i32) -> (i32, i32) {
    %c0_i32 = arith.constant 0 : i32
    %c0_i32_0 = arith.constant 0 : i32
    %c0_i32_1 = arith.constant 0 : i32
    return %c0_i32, %c0_i32_0 : i32, i32
  }
  func.func @transform_12(%arg0: i32) -> (i32, i32, i32) {
    %c0_i32 = arith.constant 0 : i32
    %c0_i32_0 = arith.constant 0 : i32
    %c0_i32_1 = arith.constant 0 : i32
    %c0_i32_2 = arith.constant 0 : i32
    return %c0_i32, %c0_i32_0, %c0_i32_1 : i32, i32, i32
  }
  func.func @transform_13(%arg0: i32) -> (i32, i32) {
    %c0_i32 = arith.constant 0 : i32
    %c0_i32_0 = arith.constant 0 : i32
    %c0_i32_1 = arith.constant 0 : i32
    return %c0_i32, %c0_i32_0 : i32, i32
  }
  func.func @transform_14(%arg0: i32) -> (i32, i32) {
    %c0_i32 = arith.constant 0 : i32
    %c0_i32_0 = arith.constant 0 : i32
    %c0_i32_1 = arith.constant 0 : i32
    return %c0_i32, %c0_i32_0 : i32, i32
  }
  func.func @transform_15(%arg0: i32) -> (i32, i32) {
    %c0_i32 = arith.constant 0 : i32
    %c0_i32_0 = arith.constant 0 : i32
    %c0_i32_1 = arith.constant 0 : i32
    return %c0_i32, %c0_i32_0 : i32, i32
  }
  func.func @transform_16(%arg0: i32) -> (i32, i32, i32) {
    %c0_i32 = arith.constant 0 : i32
    %c0_i32_0 = arith.constant 0 : i32
    %c0_i32_1 = arith.constant 0 : i32
    return %arg0, %c0_i32, %c0_i32_0 : i32, i32, i32
  }
  func.func @transform_17(%arg0: i32) -> (i32, i32, i32, i32) {
    %c0_i32 = arith.constant 0 : i32
    %c0_i32_0 = arith.constant 0 : i32
    %c0_i32_1 = arith.constant 0 : i32
    %c0_i32_2 = arith.constant 0 : i32
    return %c0_i32, %arg0, %c0_i32_0, %c0_i32_1 : i32, i32, i32, i32
  }
}

</mosaic_0001>

<bundles_post_ra>
// kernel: fft_block_forward.1
= control target key start
LH: loop header
LB: loop body
LE: loop exit
PB: predicated region body
PF: predicated region fallthrough
CT: control target
= control target key end

     0   :  { %s2705_s0 = inlined_call_operand.vmem [shape: f32[2,16,32], index: 0, kind: input, shape index: {}]   ;;  %s2706_s1 = inlined_call_operand.vmem [shape: f32[2,16,1], index: 1, kind: input, shape index: {}]   ;;  %s2707_s2 = inlined_call_operand.vmem [shape: bf16[32,32], index: 2, kind: input, shape index: {}]   ;;  %s2708_s3 = inlined_call_operand.vmem [shape: f32[1,32], index: 3, kind: input, shape index: {}]   ;;  %s2709_s4 = inlined_call_operand.vmem [shape: bf16[32,32], index: 4, kind: input, shape index: {}]   ;;  %s2710_s5 = inlined_call_operand.vmem [shape: f32[1,32], index: 5, kind: input, shape index: {}]   ;;  %s2711_s6 = inlined_call_operand.vmem [shape: bf16[32,32], index: 6, kind: input, shape index: {}]   ;;  %s2712_s7 = inlined_call_operand.vmem [shape: f32[1,32], index: 7, kind: input, shape index: {}]   ;;  %s2713_s8 = inlined_call_operand.hbm [shape: bf16[32,32], index: 8, kind: input, shape index: {}]   ;;  %s2714_s9 = inlined_call_operand.hbm [shape: f32[1,32], index: 9, kind: input, shape index: {}]   ;;  %s2715_s10 = inlined_call_operand.vmem [shape: f32[1,32], index: 10, kind: input, shape index: {}]   ;;  %s2716_s11 = inlined_call_operand.vmem [shape: f32[1,32], index: 11, kind: input, shape index: {}]   ;;  %s2717_s12 = inlined_call_operand.hbm [shape: bf16[9,32,64], index: 12, kind: input, shape index: {}]   ;;  %s2718_s13 = inlined_call_operand.hbm [shape: f32[1,64], index: 13, kind: input, shape index: {}]   ;;  %s2719_s14 = inlined_call_operand.vmem [shape: bf16[64,32], index: 14, kind: input, shape index: {}]   ;;  %s2720_s15 = inlined_call_operand.hbm [shape: f32[1,32], index: 15, kind: input, shape index: {}]   ;;  %s2721_s16 = inlined_call_operand.hbm [shape: f32[2,16,32], index: 16, kind: output, shape index: {0}]   ;;  %s2722_s17 = inlined_call_operand.hbm [shape: bf16[2,2,16,16], index: 17, kind: output, shape index: {1}]  }
   0x1   :  { %2731 = sst [smem:[#allocation29_spill]] %s2705_s0 }
   0x2   :  { %2732 = sst [smem:[#allocation30_spill]] %s2706_s1 }
   0x3   :  { %2733 = sst [smem:[#allocation31_spill]] %s2713_s8 }
   0x4   :  { %2734 = sst [smem:[#allocation32_spill]] %s2714_s9 }
   0x5   :  { %2735 = sst [smem:[#allocation33_spill]] %s2718_s13 }
   0x6   :  { %2736 = sst [smem:[#allocation34_spill]] %s2722_s17 }
   0x7   :  { %23 = vsyncpa [#allocation4], 0 }
   0x8   :  { %24 = vsyncpa [#allocation7], 0 }
   0x9   :  { %25 = vsyncpa [#allocation10], 0 }
   0xa   :  { %26 = vsyncpa [#allocation5], 0 }
   0xb   :  { %28 = vsyncpa [#allocation5 + $0x1], 0 }
   0xc   :  { %29 = vsyncpa [#allocation14], 0 }
   0xd   :  { %31 = vsyncpa [#allocation14 + $0x1], 0  ;;  %s2400_s24 = smov 0   ;;  %s2402_s25 = smov 0  }
   0xe   :  { %s2404_s26 = smov 0   ;;  %s2406_s27 = smov 0  }
   0xf LB: > { %2737 = sst [smem:[#allocation22_spill]] %s2275_s24  ;;  %s2421_s28 = sadd.s32 4294967295, %s2287_s27   ;;  %s2287_s27 = sphi %s2406_s27, %s2758_s27   ;;  %s2283_s26 = sphi %s2404_s26, %s2760_s26   ;;  %s2279_s25 = sphi %s2402_s25, %s2762_s25   ;;  %s2275_s24 = sphi %s2400_s24, %s2761_s24  }
  0x10   : > { %2738 = sst [smem:[#allocation23_spill]] %s2283_s26  ;;  %s1708_s29 = sadd.s32 4294967294, %s2287_s27  }
  0x11   : > { %2739 = sst [smem:[#allocation24_spill]] %s2287_s27  ;;  %s2425_s0 = sadd.s32 1, %s2287_s27  }
  0x12   : > { %2740 = sst [smem:[#allocation25_spill]] %s2425_s0  ;;  %s390_s30 = sadd.s32 1, %s2283_s26 }
  0x13   : > { %s387_s18 = ssub.s32 %s2287_s27, %s2425_s0  ;;  %p400_p0 = scmp.ne.s32.totalorder %s2283_s26, %s2279_s25 }
  0x14   : > { %p388_p1 = scmp.eq.s32.totalorder %s387_s18, 0  ;;  %p401_p2 = scmp.eq.s32.totalorder %s2421_s28, 1 }
  0x15   : > { %p406_p3 = scmp.ne.s32.totalorder %s2279_s25, %s2275_s24  ;;  %p407_p4 = scmp.eq.s32.totalorder %s1708_s29, 1 }
  0x16   : > { %s2436_s19 = scalar_select %p388_p1, %s2283_s26, %s390_s30  }
  0x17   : > { %p2438_p5 = por %p401_p2, %p400_p0  ;;  %p2442_p6 = por %p407_p4, %p406_p3 }
  0x18   : > { %2741 = sst [smem:[#allocation26_spill]] %s2436_s19  ;;  %p1709_p7 = scmp.ge.s32.totalorder %s2287_s27, 1 }
  0x19   : > { %s2742_s1 = scalar_select %p2438_p5, 1, 0 }
  0x1a   : > { %s2744_s20 = scalar_select %p2442_p6, 1, 0 }
  0x1b   : > { %2743 = sst [smem:[#allocation27_spill]] %s2742_s1  ;;  %p440_p8 = scmp.lt.s32.totalorder %s2287_s27, 3 }
  0x1c   : > { %2745 = sst [smem:[#allocation28_spill]] %s2744_s20  ;;  %p1963_p9 = scmp.eq.s32.totalorder %s2421_s28, 0 }
  0x1d   : > { %p2449_p10 = pnand %p1709_p7, %p440_p8  ;;  %s2747_s9 = sld [smem:[#allocation32_spill]] }
  0x1e   : > { %s2289_s30 = smov [#allocation6]   ;;  %s2748_s13 = sld [smem:[#allocation33_spill]] }
  0x1f   : > { %p1940_p11 = pneg %p2449_p10  ;;  %s486_s18 = sshll.u32 %s2289_s30, 4  ;;  %s487_s18 = int_to_ptr.vmem [resolvable:$true] %s486_s18 }
  0x20   : > { %s2750_s8 = sld [smem:[#allocation31_spill]]  ;;  %s2290_s24 = smov [#allocation9]  }
  0x21   : > { %p2463_p12 = pnand %p1963_p9, %p1940_p11  ;;  %s518_s30 = sshll.u32 %s2290_s24, 4  ;;  %s519_s30 = int_to_ptr.vmem [resolvable:$true] %s518_s30 }
  0x22   : > { %s2291_s26 = smov [#allocation3]   ;;  %s501_s17 = sshll.u32 %s2717_s12, 4  ;;  %s502_s17 = int_to_ptr.hbm [resolvable:$true] %s501_s17 }
  0x23   : > { %s484_s29 = sshll.u32 %s2747_s9, 4  ;;  %s471_s19 = sshll.u32 %s2291_s26, 4  ;;  %s485_s29 = int_to_ptr.hbm [resolvable:$true] %s484_s29  ;;  %s472_s19 = int_to_ptr.vmem [resolvable:$true] %s471_s19 }
  0x24   : > { %s516_s0 = sshll.u32 %s2748_s13, 4  ;;  %s2292_s1 = smov 64   ;;  %s517_s0 = int_to_ptr.hbm [resolvable:$true] %s516_s0 }
  0x25   : > { %1946 = dma.hbm_to_vmem [thread:$0]  (!%p2463_p12), %s485_s29, 16, %s487_s18, [#allocation7]  }
  0x26   : > { %s469_s9 = sshll.u32 %s2750_s8, 4  ;;  %s2293_s22 = smov 4   ;;  %s470_s9 = int_to_ptr.hbm [resolvable:$true] %s469_s9 }
  0x27   : > { %1952 = dma.hbm_to_vmem [thread:$0]  (!%p2463_p12), %s517_s0, 16, %s519_s30, [#allocation10]  }
  0x28   : > { %1943 = dma.hbm_to_vmem [thread:$0]  (!%p2463_p12), %s470_s9, 256, %s472_s19, [#allocation4], %s2292_s1, %s2292_s1, %s2293_s22  }
  0x29   : > { %s2294_s24 = smov [#allocation8]   ;;  %s531_s8 = sshll.u32 %s2720_s15, 4  ;;  %s532_s8 = int_to_ptr.hbm [resolvable:$true] %s531_s8 }
  0x2a   : > { %s503_s29 = sshll.u32 %s2294_s24, 4  ;;  %s2295_s0 = smov [#allocation11]   ;;  %s504_s29 = int_to_ptr.vmem [resolvable:$true] %s503_s29 }
  0x2b   : > { %1949 = dma.hbm_to_vmem [thread:$0]  (!%p2463_p12), %s502_s17, 2304, %s504_s29, [#allocation7], %s2292_s1, %s2292_s1, %s2293_s22  }
  0x2c   : > { %s533_s30 = sshll.u32 %s2295_s0, 4  ;;  %562 = sbr.rel (%p2449_p10) target bundleno = 1736 (0x6c8), region = 84  ;;  %s534_s30 = int_to_ptr.vmem [resolvable:$true] %s533_s30 }
  0x2d   : > { %1955 = dma.hbm_to_vmem [thread:$0]  (!%p2463_p12), %s532_s8, 16, %s534_s30, [#allocation10]  }
  0x31   : > { %2254 = dma.done.wait (%p1963_p9), [#allocation4], 256  }
  0x32   : > { %2256 = vsyncadd (%p1963_p9), [#allocation4], 4294967040 }
  0x33   : > { %2258 = dma.done.wait (%p1963_p9), [#allocation7], 2320  }
  0x34   : > { %2260 = vsyncadd (%p1963_p9), [#allocation7], 4294964976 }
  0x35   : > { %2262 = dma.done.wait (%p1963_p9), [#allocation10], 32  }
  0x36   : > { %2264 = vsyncadd (%p1963_p9), [#allocation10], 4294967264  ;;  %p645_p13 = scmp.lt.s32.totalorder %s2421_s28, 1  ;;  %s2751_s27 = sld [smem:[#allocation29_spill]]  ;;  %v1881_v0 = vld [vmem:[%s2709_s4 + $0x8] sm:$0xff]  ;;  %v1880_v2 = vld [vmem:[%s2709_s4] sm:$0xff] }
  0x37   : > { %v1879_v1 = vld [vmem:[%s2707_s2 + $0x8] sm:$0xff]  ;;  %729 = vmatpush.bf16.msra.mxu1 %v1881_v0  ;;  %v1878_v5 = vld [vmem:[%s2707_s2] sm:$0xff]  ;;  %vm656_vm0 = vcmask 261120   ;;  %vm785_vm1 = vcmask 130048   ;;  %s2296_s17 = smov 112   ;;  %s2554_s26 = sand.u32 1, %s2279_s25  }
  0x38   : > { %s2502_s8 = scalar_select %p645_p13, %s2421_s28, 1  ;;  %691 = vmatpush.bf16.msra.mxu0 %v1879_v1  ;;  %v2029_v9 = vld [vmem:[%s2710_s5] ss:$0 sm:$0xff]  ;;  %v1883_v37 = vld [vmem:[%s2711_s6 + $0x8] sm:$0xff]  ;;  %vm830_vm2 = vcmask 125952   ;;  %vm1466_vm10 = vcmask 523264  }
  0x39   : > { %v2030_v11 = vld [vmem:[%s2708_s3] ss:$0 sm:$0xff]  ;;  %765 = vmatpush.bf16.msra.mxu2 %v1883_v37  ;;  %s1722_s24 = sshll.u32 %s2554_s26, 4  ;;  %s2297_s18 = smov 16  }
  0x3a   : > { %s1876_s9 = sshll.u32 %s2502_s8, 4  ;;  %v1882_v38 = vld [vmem:[%s2711_s6] sm:$0xff]  ;;  %s2567_s29 = scalar_lea.vmem [#allocation13], %s1722_s24 }
  0x3b   : > { %730 = vmatpush.bf16.msra.mxu1 %v1880_v2  ;;  %v2031_v43 = vld [vmem:[%s2712_s7] ss:$0 sm:$0xff]  ;;  %s2752_s30 = sld [smem:[#allocation30_spill]]  ;;  %s1491_s21 = scalar_lea.sflag [#allocation5], %s2554_s26 }
  0x3c   : > { %s649_s1 = scalar_lea.vmem %s2751_s27, %s1876_s9  ;;  %692 = vmatpush.bf16.msra.mxu0 %v1878_v5  ;;  %s2229_s23 = scalar_lea.hbm %s2721_s16, 32 }
  0x3d   : > { %v2519_v3 = vld [vmem:[%s649_s1] sm:$0xff]  ;;  %v2521_v4 = vld [vmem:[%s649_s1 + $0x8] sm:$0xff]  ;;  %766 = vmatpush.bf16.msra.mxu2 %v1882_v38 }
  0x3e   : > { %v661_v6 = vpack.c.bf16 %v2521_v4, %v2519_v3 }
  0x40   : > { %1745 = vmatmul.msk.bf16.vlgmr.msra.gmra.mxu1 %vm656_vm0, %v661_v6  ;;  %1736 = vmatmul.msk.bf16.vlgmr.msra.gmra.mxu0 %vm656_vm0, %v661_v6 }
  0x41   : > { %1754 = vmatmul.msk.bf16.vlgmr.msra.gmra.mxu2 %vm656_vm0, %v661_v6  ;;  %s654_s13 = scalar_lea.vmem %s2752_s30, %s1876_s9  ;;  %s1908_s30 = sshll.u32 %s2421_s28, 4 }
  0x42   : > { %s1507_s9 = scalar_lea.hbm %s2721_s16, %s1908_s30 }
  0x43   : > { %s1510_s20 = sshll.u32 %s1507_s9, 4  ;;  %s1511_s20 = int_to_ptr.hbm [resolvable:$true] %s1510_s20 }
  0x44   : > { %s2223_s19 = sshra.s32 %s1511_s20, 4  ;;  %s2224_s19 = int_to_ptr.hbm [resolvable:$true] %s2223_s19 }
  0x45   : > { %s2225_s22 = scalar_lea.hbm %s2224_s19, 16  ;;  %p2230_p3 = scmp.lt.s32.totalorder %s2224_s19, %s2721_s16 }
  0x46   : > { %p2226_p0 = scmp.ne.s32.totalorder %s2224_s19, %s2225_s22  ;;  %p2231_p4 = scmp.lt.s32.totalorder %s2229_s23, %s2225_s22 }
  0x48   : > { %p2227_p1 = pnand %p2226_p0, %p2438_p5  ;;  %p2232_p7 = por %p2231_p4, %p2230_p3 }
  0x4a   : > { %p2228_p2 = pneg %p2227_p1 }
  0x4c   : > { %p2233_p8 = pnand %p2232_p7, %p2228_p2 }
  0xbd   : > { %v732_v7 = vpop.f32.mrf.mxu1  ;;  %v694_v8 = vpop.f32.mrf.mxu0 }
  0xbe   : > { %v733_v10 = vadd.f32 %v2029_v9, %v732_v7  ;;  %v695_v15 = vadd.f32 %v2030_v11, %v694_v8 }
  0xc0   : > { %v737_v14 = vpack.c.bf16 %v733_v10, %v733_v10  ;;  %v699_v21 = vmul.f32 0.25, %v695_v15 }
  0xc2   : > { %v782_v20 = vunpack.c.l.b16 %v737_v14  ;;  %v701_v25 = vpack.c.bf16 %v699_v21, %v699_v21 }
  0xc4   : > { %v777_v28 = vunpack.c.l.b16 %v701_v25  ;;  %v768_v45 = vpop.f32.mrf.mxu2 }
  0xc5   : > { %v734_v12 = vpop.f32.mrf.mxu1  ;;  %v696_v13 = vpop.f32.mrf.mxu0  ;;  %v769_v48 = vadd.f32 %v2031_v43, %v768_v45 }
  0xc6   : > { %v735_v16 = vadd.f32 %v2029_v9, %v734_v12  ;;  %v697_v17 = vadd.f32 %v2030_v11, %v696_v13 }
  0xc7   : > { %v773_v50 = vpack.c.bf16 %v769_v48, %v769_v48 }
  0xc8   : > { %v738_v18 = vpack.c.bf16 %v735_v16, %v735_v16  ;;  %v700_v19 = vmul.f32 0.25, %v697_v17 }
  0xc9   : > { %v840_v58 = vunpack.c.l.b16 %v773_v50 }
  0xca   : > { %v783_v22 = vunpack.c.l.b16 %v738_v18  ;;  %v702_v23 = vpack.c.bf16 %v700_v19, %v700_v19 }
  0xcc   : > { %v784_v24 = vpack.c.b16 %v783_v22, %v782_v20  ;;  %v778_v27 = vunpack.c.l.b16 %v702_v23  ;;  %v770_v52 = vpop.f32.mrf.mxu2 }
  0xcd   : > { %v771_v54 = vadd.f32 %v2031_v43, %v770_v52  ;;  %v2032_v52 = vld [vmem:[#allocation6] ss:$0 sm:$0xff] }
  0xce   : > { %865 = vrot.lane.b32.xlu0 %v784_v24, %s2296_s17  ;;  %v790_v26 = vsel %vm785_vm1, %v784_v24, 0  ;;  %v779_v29 = vpack.c.b16 %v778_v27, %v777_v28 }
  0xcf   : > { %799 = vmatpush.bf16.xpose.msra.mxu3 %v790_v26  ;;  %v774_v59 = vpack.c.bf16 %v771_v54, %v771_v54 }
  0xd1   : > { %v841_v61 = vunpack.c.l.b16 %v774_v59 }
  0xd3   : > { %v842_v63 = vpack.c.b16 %v841_v61, %v840_v58  ;;  %v2298_v61 = vmov 32.0  }
  0xd5   : > { %854 = vmatpush.bf16.msrb.mxu0 %v842_v63 }
  0xd6   : > { %863 = vrot.lane.b32.xlu0 %v779_v29, %s2296_s17  ;;  %1755 = vmatmul.msk.bf16.vlgmr.msra.gmra.mxu3 %vm785_vm1, %v779_v29 }
 0x140   : > { %v866_v30 = vpop.permute.xlu0 %865 }
 0x141   : > { %v871_v31 = vsel %vm785_vm1, %v866_v30, 0 }
 0x142   : > { %880 = vmatpush.bf16.xpose.msrb.mxu1 %v871_v31 }
 0x148   : > { %v864_v32 = vpop.permute.xlu0 %863 }
 0x149   : > { %1757 = vmatmul.msk.bf16.vlgmr.msrb.gmra.mxu1 %vm785_vm1, %v864_v32 }
 0x159   : > { %v801_v33 = vpop.f32.mrf.mxu3 }
 0x15a   : > { %v806_v34 = vsel %vm785_vm1, %v801_v33, -inf }
 0x15b   : > { %807 = vmax.xlane.f32.xlu2 %v806_v34  ;;  %v1885_v34 = vld [vmem:[#allocation3 + $0x8] sm:$0xff] }
 0x15c   : > { %986 = vmatpush.bf16.msrb.mxu3 %v1885_v34 }
 0x161   : > { %v803_v35 = vpop.f32.mrf.mxu3 }
 0x162   : > { %v809_v36 = vsel %vm785_vm1, %v803_v35, -inf }
 0x163   : > { %810 = vmax.xlane.f32.xlu2 %v809_v36 }
 0x17b   : > { %919 = vrot.lane.b32.xlu2 %v842_v63, %s2296_s17  ;;  %s637_s17 = scalar_lea.vmem [#allocation12], %s1722_s24 }
 0x17c   : > { %s1508_s1 = sshll.u32 %s637_s17, 4  ;;  %s1509_s1 = int_to_ptr.vmem [resolvable:$true] %s1508_s1 }
 0x1c6   : > { %v882_v39 = vpop.f32.mrf.mxu1 }
 0x1c7   : > { %v887_v40 = vsel %vm785_vm1, %v882_v39, -inf }
 0x1c8   : > { %888 = vmax.xlane.f32.xlu1 %v887_v40 }
 0x1ce   : > { %v884_v41 = vpop.f32.mrf.mxu1  ;;  %v808_v49 = vpop.xlane.xlu2 %807 }
 0x1cf   : > { %v890_v42 = vsel %vm785_vm1, %v884_v41, -inf  ;;  %v812_v56 = vsub.f32 %v801_v33, %v808_v49 }
 0x1d0   : > { %891 = vmax.xlane.f32.xlu1 %v890_v42 }
 0x1d1   : > { %v814_v62 = vmul.f32 1.442695, %v812_v56 }
 0x1d6   : > { %v811_v0 = vpop.xlane.xlu2 %810 }
 0x1d7   : > { %v813_v2 = vsub.f32 %v803_v35, %v811_v0  ;;  %v1884_v35 = vld [vmem:[#allocation3] sm:$0xff]  ;;  %v2299_v0 = vmov 0  }
 0x1d8   : > { %987 = vmatpush.bf16.msrb.mxu3 %v1884_v35  ;;  %2027 = vset.pattern.permute.xlu0 %v2299_v0 }
 0x1d9   : > { %v816_v6 = vmul.f32 1.442695, %v813_v2  ;;  %2028 = vset.pattern.permute.xlu2 %v2299_v0 }
 0x1de   : > { %v920_v11 = vpop.permute.xlu2 %919 }
 0x1df   : > { %932 = vmatpush.bf16.msrb.mxu2 %v920_v11 }
 0x23b   : > { %v889_v44 = vpop.xlane.xlu1 %888 }
 0x23c   : > { %v893_v46 = vsub.f32 %v882_v39, %v889_v44 }
 0x23e   : > { %v895_v47 = vmul.f32 1.442695, %v893_v46 }
 0x240   : > { %2037 = vpow2.f32 %v895_v47 }
 0x243   : > { %v892_v51 = vpop.xlane.xlu1 %891 }
 0x244   : > { %v894_v53 = vsub.f32 %v884_v41, %v892_v51 }
 0x246   : > { %v2038_v55 = vpop.eup %2037  ;;  %v897_v57 = vmul.f32 1.442695, %v894_v53  ;;  %v960_v53 = vadd.f32 %v2032_v52, %v2519_v3 }
 0x247   : > { %v899_v60 = vsel %vm785_vm1, %v2038_v55, 0.0 }
 0x248   : > { %2039 = vpow2.f32 %v897_v57  ;;  %900 = vadd.xlane.f32.xlu0 %v899_v60  ;;  %v961_v57 = vadd.f32 %v2032_v52, %v2521_v4  ;;  %v2034_v52 = vld [vmem:[%s2716_s11] ss:$0 sm:$0xff] }
 0x249   : > { %2041 = vpow2.f32 %v814_v62 }
 0x24a   : > { %2043 = vpow2.f32 %v816_v6 }
 0x24e   : > { %v2040_v1 = vpop.eup %2039 }
 0x24f   : > { %v902_v5 = vsel %vm785_vm1, %v2040_v1, 0.0  ;;  %v2042_v7 = vpop.eup %2041 }
 0x250   : > { %903 = vadd.xlane.f32.xlu1 %v902_v5  ;;  %v818_v8 = vsel %vm785_vm1, %v2042_v7, 0.0  ;;  %v2044_v9 = vpop.eup %2043 }
 0x251   : > { %v821_v10 = vsel %vm785_vm1, %v2044_v9, 0.0 }
 0x258   : > { %819 = vadd.xlane.f32.xlu1 %v818_v8  ;;  %v1060_v8 = vld [vmem:[%s654_s13 + $0x8] sm:$0xff] }
 0x260   : > { %822 = vadd.xlane.f32.xlu1 %v821_v10 }
 0x2bb   : > { %v901_v12 = vpop.xlane.xlu0 %900 }
 0x2bc   : > { %2045 = vrcp.f32 %v901_v12 }
 0x2c2   : > { %v2046_v13 = vpop.eup %2045 }
 0x2c3   : > { %v907_v14 = vmul.f32 %v2046_v13, %v2038_v55  ;;  %v904_v15 = vpop.xlane.xlu1 %903 }
 0x2c4   : > { %2047 = vrcp.f32 %v904_v15 }
 0x2c5   : > { %v909_v16 = vpack.c.bf16 %v907_v14, %v907_v14 }
 0x2c7   : > { %1758 = vst.msk [vmem:[%s2567_s29 + $0x8] sm:$0xf] %vm830_vm2, %v909_v16  ;;  %v916_v21 = vunpack.c.l.b16 %v909_v16  ;;  %v1059_v16 = vld [vmem:[%s654_s13] sm:$0xff] }
 0x2ca   : > { %v2048_v17 = vpop.eup %2047 }
 0x2cb   : > { %v908_v18 = vmul.f32 %v2048_v17, %v2040_v1  ;;  %v820_v19 = vpop.xlane.xlu1 %819  ;;  %v2300_v17 = vmov 0.0  }
 0x2cc   : > { %2049 = vrcp.f32 %v820_v19  ;;  %657 = vst.msk [vmem:[#allocation2] sm:$0xff] %vm656_vm0, %v2300_v17 }
 0x2cd   : > { %v910_v20 = vpack.c.bf16 %v908_v18, %v908_v18  ;;  %658 = vst.msk [vmem:[#allocation2 + $0x18] sm:$0xff] %vm656_vm0, %v2300_v17 }
 0x2cf   : > { %1759 = vst.msk [vmem:[%s2567_s29 + $0xc] sm:$0xf] %vm830_vm2, %v910_v20  ;;  %v917_v22 = vunpack.c.l.b16 %v910_v20 }
 0x2d1   : > { %v918_v23 = vpack.c.b16 %v917_v22, %v916_v21  ;;  %v1889_v21 = vld [vmem:[#allocation8 + $0x18] sm:$0xff]  ;;  %v1887_v22 = vld [vmem:[#allocation8 + $0x8] sm:$0xff] }
 0x2d2   : > { %v2050_v24 = vpop.eup %2049  ;;  %1111 = vmatpush.bf16.msra.mxu0 %v1889_v21  ;;  %1140 = vmatpush.bf16.msra.mxu1 %v1887_v22 }
 0x2d3   : > { %v826_v25 = vmul.f32 %v2050_v24, %v2042_v7  ;;  %v823_v26 = vpop.xlane.xlu1 %822  ;;  %1760 = vmatmul.msk.bf16.vlgmr.msrb.gmra.mxu2 %vm785_vm1, %v918_v23  ;;  %v1891_v23 = vld [vmem:[#allocation8 + $0x28] sm:$0xff] }
 0x2d4   : > { %2051 = vrcp.f32 %v823_v26  ;;  %1177 = vmatpush.bf16.msra.mxu2 %v1891_v23 }
 0x2d5   : > { %v828_v27 = vpack.c.bf16 %v826_v25, %v826_v25  ;;  %2053 = vrcp.f32 %v2298_v61  ;;  %v1893_v25 = vld [vmem:[#allocation8 + $0x38] sm:$0xff] }
 0x2d6   : > { %1216 = vmatpush.bf16.msra.mxu3 %v1893_v25 }
 0x2d7   : > { %831 = vst.msk [vmem:[%s2567_s29] sm:$0xf] %vm830_vm2, %v828_v27  ;;  %v835_v31 = vunpack.c.l.b16 %v828_v27  ;;  %v1888_v27 = vld [vmem:[#allocation8 + $0x10] sm:$0xff] }
 0x2d8   : > { %1112 = vmatpush.bf16.msra.mxu0 %v1888_v27 }
 0x2da   : > { %v2052_v28 = vpop.eup %2051 }
 0x2db   : > { %v827_v29 = vmul.f32 %v2052_v28, %v2044_v9  ;;  %v2054_v62 = vpop.eup %2053  ;;  %v1886_v28 = vld [vmem:[#allocation8] sm:$0xff] }
 0x2dc   : > { %v1003_v63 = vmul.f32 32.0, %v2054_v62  ;;  %vm1007_vm3 = vweird.f32 %v2054_v62  ;;  %1141 = vmatpush.bf16.msra.mxu1 %v1886_v28 }
 0x2dd   : > { %v829_v30 = vpack.c.bf16 %v827_v29, %v827_v29  ;;  %v1890_v29 = vld [vmem:[#allocation8 + $0x20] sm:$0xff] }
 0x2de   : > { %v1004_v3 = vsub.f32 1.0, %v1003_v63  ;;  %1178 = vmatpush.bf16.msra.mxu2 %v1890_v29 }
 0x2df   : > { %832 = vst.msk [vmem:[%s2567_s29 + $0x4] sm:$0xf] %vm830_vm2, %v829_v30  ;;  %v836_v32 = vunpack.c.l.b16 %v829_v30  ;;  %v1892_v30 = vld [vmem:[#allocation8 + $0x30] sm:$0xff] }
 0x2e0   : > { %v1005_v1 = vmul.f32 %v2054_v62, %v1004_v3  ;;  %1217 = vmatpush.bf16.msra.mxu3 %v1892_v30 }
 0x2e1   : > { %v837_v33 = vpack.c.b16 %v836_v32, %v835_v31 }
 0x2e2   : > { %v1006_v2 = vadd.f32 %v2054_v62, %v1005_v1 }
 0x2e3   : > { %1756 = vmatmul.msk.bf16.vlgmr.msrb.gmra.mxu0 %vm785_vm1, %v837_v33 }
 0x2e4   : > { %v1008_v5 = vsel %vm1007_vm3, %v2054_v62, %v1006_v2 }
 0x356   : > { %v934_v36 = vpop.f32.mrf.mxu2 }
 0x357   : > { %v939_v37 = vpack.c.bf16 %v934_v36, %v934_v36 }
 0x359   : > { %v948_v40 = vunpack.c.l.b16 %v939_v37  ;;  %v1895_v37 = vld [vmem:[#allocation8 + $0x48] sm:$0xff] }
 0x35a   : > { %1255 = vmatpush.bf16.msrb.mxu0 %v1895_v37 }
 0x35e   : > { %v936_v38 = vpop.f32.mrf.mxu2 }
 0x35f   : > { %v940_v39 = vpack.c.bf16 %v936_v38, %v936_v38  ;;  %v1897_v38 = vld [vmem:[#allocation8 + $0x58] sm:$0xff] }
 0x360   : > { %v856_v43 = vpop.f32.mrf.mxu0  ;;  %1294 = vmatpush.bf16.msrb.mxu1 %v1897_v38  ;;  %v1905_v38 = vld [vmem:[%s2719_s14 + $0x8] sm:$0xff] }
 0x361   : > { %v949_v41 = vunpack.c.l.b16 %v940_v39  ;;  %v861_v46 = vpack.c.bf16 %v856_v43, %v856_v43  ;;  %v1899_v39 = vld [vmem:[#allocation8 + $0x68] sm:$0xff] }
 0x362   : > { %1333 = vmatpush.bf16.msrb.mxu2 %v1899_v39 }
 0x363   : > { %v950_v42 = vpack.c.b16 %v949_v41, %v948_v40  ;;  %v943_v48 = vunpack.c.l.b16 %v861_v46  ;;  %v1901_v41 = vld [vmem:[#allocation8 + $0x78] sm:$0xff]  ;;  %v1896_v46 = vld [vmem:[#allocation8 + $0x50] sm:$0xff] }
 0x364   : > { %1295 = vmatpush.bf16.msrb.mxu1 %v1896_v46 }
 0x365   : > { %951 = vrot.lane.b32.xlu1 %v950_v42, %s2297_s18 }
 0x368   : > { %v858_v44 = vpop.f32.mrf.mxu0 }
 0x369   : > { %v862_v45 = vpack.c.bf16 %v858_v44, %v858_v44  ;;  %v2033_v44 = vld [vmem:[%s2715_s10] ss:$0 sm:$0xff] }
 0x36b   : > { %v944_v47 = vunpack.c.l.b16 %v862_v45  ;;  %v1894_v45 = vld [vmem:[#allocation8 + $0x40] sm:$0xff] }
 0x36c   : > { %1256 = vmatpush.bf16.msrb.mxu0 %v1894_v45 }
 0x36d   : > { %v945_v49 = vpack.c.b16 %v944_v47, %v943_v48  ;;  %v1898_v47 = vld [vmem:[#allocation8 + $0x60] sm:$0xff]  ;;  %v1900_v48 = vld [vmem:[#allocation8 + $0x70] sm:$0xff] }
 0x36e   : > { %1334 = vmatpush.bf16.msrb.mxu2 %v1898_v47 }
 0x3d7   : > { %v952_v50 = vpop.permute.xlu1 %951 }
 0x3d8   : > { %v955_v51 = vsel %vm785_vm1, %v945_v49, %v952_v50 }
 0x3d9   : > { %1769 = vmatmul.msk.bf16.vlgmr.msrb.gmra.mxu3 %vm656_vm0, %v955_v51 }
 0x3da   : > { %1372 = vmatpush.bf16.msrb.mxu3 %v1901_v41 }
 0x3de   : > { %1373 = vmatpush.bf16.msrb.mxu3 %v1900_v48 }
 0x45c   : > { %v989_v54 = vpop.f32.mrf.mxu3 }
 0x45d   : > { %v994_v55 = vadd.f32 %v989_v54, %v960_v53 }
 0x45f   : > { %v996_v56 = vsel %vm656_vm0, %v994_v55, 0.0 }
 0x460   : > { %997 = vadd.xlane.f32.xlu2 %v996_v56 }
 0x464   : > { %v991_v58 = vpop.f32.mrf.mxu3 }
 0x465   : > { %v995_v59 = vadd.f32 %v991_v58, %v961_v57 }
 0x467   : > { %v999_v60 = vsel %vm656_vm0, %v995_v59, 0.0 }
 0x468   : > { %1000 = vadd.xlane.f32.xlu0 %v999_v60 }
 0x478   : > { %1068 = vperm.xlu2 %2028, %v1060_v8  }
 0x4d3   : > { %v998_v6 = vpop.xlane.xlu2 %997 }
 0x4d4   : > { %v1009_v4 = vmul.f32 %v1008_v5, %v998_v6 }
 0x4d6   : > { %v2585_v7 = vsub.f32 %v994_v55, %v1009_v4 }
 0x4d8   : > { %v1013_v9 = vmul.f32 %v2585_v7, %v2585_v7 }
 0x4da   : > { %v1015_v10 = vsel %vm656_vm0, %v1013_v9, 0.0 }
 0x4db   : > { %1016 = vadd.xlane.f32.xlu1 %v1015_v10  ;;  %v1001_v11 = vpop.xlane.xlu0 %1000  ;;  %v2617_v63 = vpop.permute.xlu2 %1068 }
 0x4dc   : > { %v1010_v12 = vmul.f32 %v1008_v5, %v1001_v11 }
 0x4de   : > { %v2595_v13 = vsub.f32 %v995_v59, %v1010_v12 }
 0x4e0   : > { %v1014_v14 = vmul.f32 %v2595_v13, %v2595_v13 }
 0x4e2   : > { %v1018_v15 = vsel %vm656_vm0, %v1014_v14, 0.0 }
 0x4e3   : > { %1019 = vadd.xlane.f32.xlu0 %v1018_v15  ;;  %v1902_v15 = vld [vmem:[#allocation8 + $0x80] sm:$0xff] }
 0x4f7   : > { %1063 = vperm.xlu0 %2027, %v1059_v16  }
 0x54e   : > { %v1017_v18 = vpop.xlane.xlu1 %1016 }
 0x54f   : > { %v1021_v19 = vmul.f32 %v1017_v18, %v1008_v5 }
 0x551   : > { %v1023_v20 = vadd.f32 1e-05, %v1021_v19 }
 0x553   : > { %2055 = vrsqrt.f32 %v1023_v20  ;;  %vm1031_vm5 = vweird.f32 %v1023_v20 }
 0x556   : > { %v1020_v24 = vpop.xlane.xlu0 %1019 }
 0x557   : > { %v1022_v26 = vmul.f32 %v1020_v24, %v1008_v5 }
 0x559   : > { %v2056_v31 = vpop.eup %2055  ;;  %v1024_v32 = vadd.f32 1e-05, %v1022_v26 }
 0x55a   : > { %v1026_v33 = vmul.f32 %v2056_v31, %v1023_v20  ;;  %vm1032_vm4 = vweird.f32 %v2056_v31 }
 0x55b   : > { %2057 = vrsqrt.f32 %v1024_v32  ;;  %vm1033_vm6 = vmor %vm1031_vm5, %vm1032_vm4  ;;  %vm1041_vm8 = vweird.f32 %v1024_v32 }
 0x55c   : > { %v1027_v34 = vmul.f32 %v2056_v31, %v1026_v33  ;;  %v1906_v33 = vld [vmem:[%s2719_s14 + $0x10] sm:$0xff] }
 0x55e   : > { %v1028_v35 = vmul.f32 0.5, %v1027_v34 }
 0x560   : > { %v1029_v36 = vsub.f32 1.5, %v1028_v35 }
 0x561   : > { %v2058_v40 = vpop.eup %2057 }
 0x562   : > { %v1030_v42 = vmul.f32 %v2056_v31, %v1029_v36  ;;  %v1036_v43 = vmul.f32 %v2058_v40, %v1024_v32  ;;  %vm1042_vm7 = vweird.f32 %v2058_v40  ;;  %v1907_v32 = vld [vmem:[%s2719_s14 + $0x18] sm:$0xff] }
 0x563   : > { %vm1043_vm9 = vmor %vm1041_vm8, %vm1042_vm7 }
 0x564   : > { %v1037_v49 = vmul.f32 %v2058_v40, %v1036_v43  ;;  %v1034_v50 = vsel %vm1033_vm6, %v2056_v31, %v1030_v42 }
 0x565   : > { %v1045_v51 = vmul.f32 %v1034_v50, %v2585_v7 }
 0x566   : > { %v1038_v53 = vmul.f32 0.5, %v1037_v49 }
 0x567   : > { %v1051_v54 = vmul.f32 %v2033_v44, %v1045_v51 }
 0x568   : > { %v1039_v55 = vsub.f32 1.5, %v1038_v53 }
 0x569   : > { %v1057_v56 = vadd.f32 %v2034_v52, %v1051_v54  ;;  %v2609_v57 = vpop.permute.xlu0 %1063 }
 0x56a   : > { %v1040_v58 = vmul.f32 %v2058_v40, %v1039_v55 }
 0x56b   : > { %v2612_v59 = vmul.f32 %v2609_v57, %v1057_v56 }
 0x56c   : > { %v1044_v60 = vsel %vm1043_vm9, %v2058_v40, %v1040_v58  ;;  %v1904_v40 = vld [vmem:[%s2719_s14] sm:$0xff] }
 0x56d   : > { %1073 = vst.msk [vmem:[#allocation2 + $0x8] sm:$0xff] %vm656_vm0, %v2612_v59  ;;  %v1046_v61 = vmul.f32 %v1044_v60, %v2595_v13  ;;  %v1903_v13 = vld [vmem:[#allocation8 + $0x88] sm:$0xff] }
 0x56f   : > { %v1052_v62 = vmul.f32 %v2033_v44, %v1046_v61 }
 0x571   : > { %v1058_v0 = vadd.f32 %v2034_v52, %v1052_v62 }
 0x573   : > { %v2620_v3 = vmul.f32 %v2617_v63, %v1058_v0 }
 0x574   : > { %v1082_v1 = vld [vmem:[#allocation2 + $0x5] sm:$0xff] }
 0x575   : > { %1074 = vst.msk [vmem:[#allocation2 + $0x10] sm:$0xff] %vm656_vm0, %v2620_v3  ;;  %v1075_v2 = vld [vmem:[#allocation2 + $0x4] sm:$0xff] }
 0x576   : > { %v1148_v5 = vld [vmem:[#allocation2 + $0x6] sm:$0xff] }
 0x577   : > { %v1187_v11 = vld [vmem:[#allocation2 + $0x7] sm:$0xff] }
 0x578   : > { %v1226_v23 = vld [vmem:[#allocation2 + $0x8] sm:$0xff] }
 0x57c   : > { %v1083_v6 = vld [vmem:[#allocation2 + $0xd] sm:$0xff] }
 0x57d   : > { %v1076_v4 = vld [vmem:[#allocation2 + $0xc] sm:$0xff]  ;;  %v1084_v8 = vpack.c.bf16 %v1083_v6, %v1082_v1  ;;  %v1383_v28 = vld [vmem:[#allocation2 + $0x14] sm:$0xff] }
 0x57e   : > { %v1149_v7 = vld [vmem:[#allocation2 + $0xe] sm:$0xff]  ;;  %v1077_v9 = vpack.c.bf16 %v1076_v4, %v1075_v2  ;;  %v1384_v29 = vpack.c.bf16 %v1383_v28, %v1076_v4 }
 0x57f   : > { %v1150_v10 = vpack.c.bf16 %v1149_v7, %v1148_v5  ;;  %v1188_v12 = vld [vmem:[#allocation2 + $0xf] sm:$0xff]  ;;  %1778 = vmatmul.msk.bf16.vlgmr.msra.gmra.mxu0 %vm656_vm0, %v1084_v8  ;;  %v2035_v5 = vld [vmem:[#allocation9] ss:$0 sm:$0xff] }
 0x580   : > { %v1189_v14 = vpack.c.bf16 %v1188_v12, %v1187_v11  ;;  %1787 = vmatmul.msk.bf16.vlgmr.msra.gmra.mxu1 %vm656_vm0, %v1077_v9  ;;  %1411 = vmatpush.bf16.msra.mxu0 %v1903_v13  ;;  %v1227_v16 = vld [vmem:[#allocation2 + $0x10] sm:$0xff] }
 0x581   : > { %1796 = vmatmul.msk.bf16.vlgmr.msra.gmra.mxu2 %vm656_vm0, %v1150_v10  ;;  %v1265_v17 = vld [vmem:[#allocation2 + $0x9] sm:$0xff]  ;;  %v1266_v18 = vld [vmem:[#allocation2 + $0x11] sm:$0xff]  ;;  %v1228_v24 = vpack.c.bf16 %v1227_v16, %v1226_v23  ;;  %1474 = vmatpush.bf16.msra.mxu1 %v1907_v32 }
 0x582   : > { %1805 = vmatmul.msk.bf16.vlgmr.msra.gmra.mxu3 %vm656_vm0, %v1189_v14  ;;  %v1304_v19 = vld [vmem:[#allocation2 + $0xa] sm:$0xff]  ;;  %v1305_v20 = vld [vmem:[#allocation2 + $0x12] sm:$0xff]  ;;  %v1267_v25 = vpack.c.bf16 %v1266_v18, %v1265_v17  ;;  %v2036_v14 = vld [vmem:[#allocation11] ss:$0 sm:$0xff] }
 0x583   : > { %v1343_v21 = vld [vmem:[#allocation2 + $0xb] sm:$0xff]  ;;  %v1344_v22 = vld [vmem:[#allocation2 + $0x13] sm:$0xff]  ;;  %v1306_v26 = vpack.c.bf16 %v1305_v20, %v1304_v19 }
 0x584   : > { %1412 = vmatpush.bf16.msra.mxu0 %v1902_v15  ;;  %v1345_v27 = vpack.c.bf16 %v1344_v22, %v1343_v21 }
 0x585   : > { %1475 = vmatpush.bf16.msra.mxu1 %v1906_v33 }
 0x589   : > { %1476 = vmatpush.bf16.msra.mxu1 %v1905_v38 }
 0x58d   : > { %1477 = vmatpush.bf16.msra.mxu1 %v1904_v40 }
 0x58f   : > { %1814 = vmatmul.msk.bf16.vlgmr.msrb.gmra.mxu0 %vm656_vm0, %v1228_v24 }
 0x590   : > { %1823 = vmatmul.msk.bf16.vlgmr.msrb.gmra.mxu1 %vm656_vm0, %v1267_v25 }
 0x591   : > { %1832 = vmatmul.msk.bf16.vlgmr.msrb.gmra.mxu2 %vm656_vm0, %v1306_v26 }
 0x592   : > { %1841 = vmatmul.msk.bf16.vlgmr.msrb.gmra.mxu3 %vm656_vm0, %v1345_v27 }
 0x59f   : > { %1850 = vmatmul.msk.bf16.vlgmr.msra.gmra.mxu0 %vm656_vm0, %v1384_v29 }
 0x5fc   : > { %v1114_v30 = vpop.f32.mrf.mxu0 }
 0x5fd   : > { %v1143_v31 = vpop.f32.mrf.mxu1 }
 0x5fe   : > { %v1144_v42 = vadd.f32 %v1143_v31, %v1114_v30 }
 0x604   : > { %v1180_v34 = vpop.f32.mrf.mxu2  ;;  %v1116_v36 = vpop.f32.mrf.mxu0 }
 0x605   : > { %v1219_v35 = vpop.f32.mrf.mxu3  ;;  %v1145_v37 = vpop.f32.mrf.mxu1  ;;  %v1185_v44 = vadd.f32 %v1180_v34, %v1144_v42 }
 0x606   : > { %v1146_v45 = vadd.f32 %v1145_v37, %v1116_v36 }
 0x607   : > { %v1224_v47 = vadd.f32 %v1219_v35, %v1185_v44 }
 0x60c   : > { %v1182_v39 = vpop.f32.mrf.mxu2  ;;  %v1258_v41 = vpop.f32.mrf.mxu0 }
 0x60d   : > { %v1221_v43 = vpop.f32.mrf.mxu3  ;;  %v1297_v46 = vpop.f32.mrf.mxu1  ;;  %v1186_v48 = vadd.f32 %v1182_v39, %v1146_v45  ;;  %v1263_v51 = vadd.f32 %v1258_v41, %v1224_v47 }
 0x60f   : > { %v1225_v52 = vadd.f32 %v1221_v43, %v1186_v48  ;;  %v1302_v54 = vadd.f32 %v1297_v46, %v1263_v51 }
 0x614   : > { %v1336_v49 = vpop.f32.mrf.mxu2  ;;  %v1260_v50 = vpop.f32.mrf.mxu0 }
 0x615   : > { %v1375_v53 = vpop.f32.mrf.mxu3  ;;  %v1264_v55 = vadd.f32 %v1260_v50, %v1225_v52  ;;  %v1341_v56 = vadd.f32 %v1336_v49, %v1302_v54  ;;  %v1299_v58 = vpop.f32.mrf.mxu1 }
 0x617   : > { %v1303_v62 = vadd.f32 %v1299_v58, %v1264_v55  ;;  %v1380_v0 = vadd.f32 %v1375_v53, %v1341_v56 }
 0x61c   : > { %v1338_v60 = vpop.f32.mrf.mxu2  ;;  %v1414_v61 = vpop.f32.mrf.mxu0 }
 0x61d   : > { %v1342_v1 = vadd.f32 %v1338_v60, %v1303_v62  ;;  %v1419_v2 = vadd.f32 %v1414_v61, %v1380_v0  ;;  %v1377_v6 = vpop.f32.mrf.mxu3 }
 0x61f   : > { %v1381_v4 = vadd.f32 %v1377_v6, %v1342_v1  ;;  %v1425_v8 = vadd.f32 %v2035_v5, %v1419_v2 }
 0x621   : > { %v1427_v11 = vmax.f32 %v1425_v8, 0.0 }
 0x624   : > { %v1416_v7 = vpop.f32.mrf.mxu0 }
 0x625   : > { %v1420_v9 = vadd.f32 %v1416_v7, %v1381_v4 }
 0x627   : > { %v1426_v10 = vadd.f32 %v2035_v5, %v1420_v9 }
 0x629   : > { %v1428_v12 = vmax.f32 %v1426_v10, 0.0 }
 0x62b   : > { %v1429_v13 = vpack.c.bf16 %v1428_v12, %v1427_v11 }
 0x62d   : > { %1867 = vmatmul.msk.bf16.vlgmr.msra.gmra.mxu1 %vm1466_vm10, %v1429_v13 }
 0x6aa   : > { %v1479_v15 = vpop.f32.mrf.mxu1 }
 0x6ab   : > { %v1480_v16 = vadd.f32 %v2036_v14, %v1479_v15 }
 0x6ad   : > { %v1484_v17 = vadd.f32 %v1480_v16, %v2612_v59 }
 0x6af   : > { %v1486_v18 = vmul.f32 %v1484_v17, %v2609_v57 }
 0x6b1   : > { %1488 = vst.msk [vmem:[%s637_s17] sm:$0xff] %vm656_vm0, %v1486_v18 }
 0x6b2   : > { %v1481_v19 = vpop.f32.mrf.mxu1 }
 0x6b3   : > { %v1482_v20 = vadd.f32 %v2036_v14, %v1481_v19 }
 0x6b5   : > { %v1485_v21 = vadd.f32 %v1482_v20, %v2620_v3 }
 0x6b7   : > { %v1487_v59 = vmul.f32 %v1485_v21, %v2617_v63 }
 0x6b9   : > { %1489 = vst.msk [vmem:[%s637_s17 + $0x8] sm:$0xff] %vm656_vm0, %v1487_v59 }
 0x6ba   : > { %2236 = shalt.err (!%p2233_p8)
}
 0x6bb   : > { %s2301_s13 = smov 128   ;;  %s2302_s8 = smov 8  }
 0x6bc   : > { %1930 = dma.vmem_to_hbm [thread:$0]  (%p2438_p5), %s1509_s1, 256, %s1511_s20, %s1491_s21, %s2301_s13, %s2301_s13, %s2302_s8  }
 0x6bd   : > { %s1496_s9 = scalar_lea.sflag [#allocation14], %s2554_s26 }
 0x6be   : > { %s1909_s17 = sshll.u32 %s2421_s28, 3  ;;  %s1535_s19 = sshll.u32 %s2567_s29, 4  ;;  %s1536_s19 = int_to_ptr.vmem [resolvable:$true] %s1535_s19 }
 0x6bf   : > { %s2754_s18 = sld [smem:[#allocation34_spill]]  ;;  %s2303_s1 = smov 128  }
 0x6c0   : > { %1931 = sst [smem:[#allocation16]] (%p2438_p5), %s2303_s1  ;;  %s2304_s26 = smov 256  }
 0x6c1   : > { %1932 = sst [smem:[#allocation16 + $0x1]] (%p2438_p5), %s2304_s26  ;;  %s2305_s20 = smov 2  }
 0x6c2   : > { %1933 = sst [smem:[#allocation16 + $0x2]] (%p2438_p5), %s2305_s20  ;;  %s2306_s28 = smov 64  }
 0x6c3   : > { %1934 = sst [smem:[#allocation16 + $0x3]] (%p2438_p5), %s2306_s28  ;;  %s2307_s29 = smov 4  }
 0x6c4   : > { %1935 = sst [smem:[#allocation16 + $0x4]] (%p2438_p5), %s2306_s28  ;;  %s2308_s21 = smov [#allocation15]  }
 0x6c5   : > { %s1524_s23 = scalar_lea.hbm %s2754_s18, %s1909_s17  ;;  %1936 = sst [smem:[#allocation16 + $0x5]] (%p2438_p5), %s2307_s29 }
 0x6c6   : > { %s1537_s0 = sshll.u32 %s1524_s23, 4  ;;  %s2309_s30 = smov 0   ;;  %s1538_s0 = int_to_ptr.hbm [resolvable:$true] %s1537_s0 }
 0x6c7   : > { %1937 = dma.general (%p2438_p5), %s1536_s19, 256, %s1538_s0, %s1496_s9, %s2308_s21, [#allocation16], %s2309_s30, 0  }
 0x6c8 PF: > { %s2755_s13 = sld [smem:[#allocation24_spill]] }
 0x6c9   : > { %s2756_s8 = sld [smem:[#allocation22_spill]] }
 0x6ce   : > { %p1973_p9 = scmp.ge.s32.totalorder %s2755_s13, 2 }
 0x6cf   : > { %s1565_s22 = sand.u32 1, %s2756_s8  }
 0x6d0   : > { %p1957_p10 = pnand %p1973_p9, %p2442_p6  ;;  %s1566_s24 = scalar_lea.sflag [#allocation5], %s1565_s22 }
 0x6d2   : > { %p1958_p11 = pneg %p1957_p10 }
 0x6d4   : > { %2266 = dma.done.wait (%p1958_p11), %s1566_s24, 256  }
 0x6d5   : > { %2268 = vsyncadd (%p1958_p11), %s1566_s24, 4294967040  ;;  %s1576_s18 = scalar_lea.sflag [#allocation14], %s1565_s22 }
 0x6d6   : > { %2270 = dma.done.wait (%p1958_p11), %s1576_s18, 256  }
 0x6d7   : > { %2272 = vsyncadd (%p1958_p11), %s1576_s18, 4294967040  ;;  %s2758_s27 = sld [smem:[#allocation25_spill]]  ;;  %s2761_s24 = smov %s2279_s25 }
 0x6d8   : > { %s2759_s23 = sld [smem:[#allocation23_spill]] }
 0x6d9   : > { %s2760_s26 = sld [smem:[#allocation26_spill]] }
 0x6dd   : > { %p34_p5 = scmp.ge.s32.totalorder %s2758_s27, 4  }
 0x6de   : > { %s2762_s25 = smov %s2759_s23 }
 0x6df   :  { %36 = sbr.rel (!%p34_p5) target bundleno = 15 (0xf), region = 174 }
 0x6e4   :  { %1582 = vsyncpa [#allocation4], 1 }
 0x6e5   :  { %1584 = vsyncpa [#allocation4 + $0x1], 1 }
 0x6e6   :  { %1585 = vsyncpa [#allocation7], 1 }
 0x6e7   :  { %1586 = vsyncpa [#allocation10], 1 }
 0x6e8   :  { %1587 = vsyncpa [#allocation5], 1 }
 0x6e9   :  { %1589 = vsyncpa [#allocation5 + $0x1], 1 }
 0x6ea   :  { %1590 = vsyncpa [#allocation14], 1 }
 0x6eb   :  { %1592 = vsyncpa [#allocation14 + $0x1], 1 }

</bundles_post_ra>
